<compile_context>
chip_gen: v7x
topology: tpu7x:2x2x1
jax: 0.10.0
libtpu: 0.0.40
codegen_flags: <defaults>
</compile_context>

<pallas_src>
import jax
import jax.numpy as jnp
from jax.experimental import pallas as pl
from jax.experimental.pallas import tpu as pltpu

INPUT_SIZE = 784   # LSM input features (chosen; reservoir must be 784 for LNN.fc1)
RESERVOIR = 784    # LSM reservoir size
HIDDEN = 256       # LNN fc1 output
LATENT = 128       # latent_size
OUTPUT = 784       # output_size (SNN fc output)

MAX_TM = 256       # batch tile: multiple of 8, amortizes per-step overhead,
                   # fits comfortably in v5e/v6e/v7x scoped VMEM.


def _hybrid_kernel(x_ref, wr_ref, br_ref, w1_ref, b1_ref,
                   w2_ref, b2_ref, w3_ref, b3_ref, o_ref):
    # x_ref: (TM, 784) bf16; weights bf16 (in, out); biases (1, N) f32.
    # LSM: tanh(x @ Wr + br)   (bf16 MXU matmul, f32 accumulate, tanh on EUP)
    r = jnp.dot(x_ref[...], wr_ref[...], preferred_element_type=jnp.float32)
    r = jnp.tanh(r + br_ref[...])
    # LNN fc1 + ReLU
    h = jnp.dot(r.astype(jnp.bfloat16), w1_ref[...],
                preferred_element_type=jnp.float32) + b1_ref[...]
    h = jnp.maximum(h, 0.0)
    # LNN fc2
    z = jnp.dot(h.astype(jnp.bfloat16), w2_ref[...],
                preferred_element_type=jnp.float32) + b2_ref[...]
    # SNN: spikes = (fc(z) > 0.5).float()
    s = jnp.dot(z.astype(jnp.bfloat16), w3_ref[...],
                preferred_element_type=jnp.float32) + b3_ref[...]
    o_ref[...] = (s > 0.5).astype(o_ref.dtype)


def hybrid_liquid_model(x, wr, br, w1, b1, w2, b2, w3, b3):
    """x: (B, INPUT_SIZE) f32; returns (B, OUTPUT) f32 spikes (0.0 / 1.0)."""
    B = x.shape[0]
    tm = min(MAX_TM, ((B + 7) // 8) * 8)        # batch tile, multiple of 8
    n_tiles = pl.cdiv(B, tm)
    bp = n_tiles * tm
    if bp != B:                                  # pad batch to a tile multiple
        x = jnp.pad(x, ((0, bp - B), (0, 0)))

    # bf16 activations/weights for the MXU; biases / accumulation stay f32.
    # TODO(synk): K=784 is not a multiple of 128; zero-padding x/Wr/W1 to 896
    # upstream would shave ~10-20% of MXU passes once compute-bound.
    x_bf = x.astype(jnp.bfloat16)
    wr_bf = wr.astype(jnp.bfloat16)
    w1_bf = w1.astype(jnp.bfloat16)
    w2_bf = w2.astype(jnp.bfloat16)
    w3_bf = w3.astype(jnp.bfloat16)
    br2 = br.reshape(1, RESERVOIR).astype(jnp.float32)
    b12 = b1.reshape(1, HIDDEN).astype(jnp.float32)
    b22 = b2.reshape(1, LATENT).astype(jnp.float32)
    b32 = b3.reshape(1, OUTPUT).astype(jnp.float32)

    flops = 2 * bp * (INPUT_SIZE * RESERVOIR + RESERVOIR * HIDDEN
                      + HIDDEN * LATENT + LATENT * OUTPUT)
    bytes_accessed = (x_bf.size * 2
                      + (wr_bf.size + w1_bf.size + w2_bf.size + w3_bf.size) * 2
                      + (br2.size + b12.size + b22.size + b32.size) * 4
                      + bp * OUTPUT * 4)

    def wspec(shape):
        return pl.BlockSpec(shape, lambda i: (0, 0))   # VMEM-resident across tiles

    out = pl.pallas_call(
        _hybrid_kernel,
        out_shape=jax.ShapeDtypeStruct((bp, OUTPUT), jnp.float32),
        grid_spec=pltpu.PrefetchScalarGridSpec(
            num_scalar_prefetch=0,
            grid=(n_tiles,),
            in_specs=[
                pl.BlockSpec((tm, INPUT_SIZE), lambda i: (i, 0)),
                wspec((INPUT_SIZE, RESERVOIR)), wspec((1, RESERVOIR)),
                wspec((RESERVOIR, HIDDEN)),     wspec((1, HIDDEN)),
                wspec((HIDDEN, LATENT)),        wspec((1, LATENT)),
                wspec((LATENT, OUTPUT)),        wspec((1, OUTPUT)),
            ],
            out_specs=pl.BlockSpec((tm, OUTPUT), lambda i: (i, 0)),
        ),
        compiler_params=pltpu.CompilerParams(
            dimension_semantics=("parallel",)),        # 2 TCs on v7x
        cost_estimate=pl.CostEstimate(
            flops=flops,
            transcendentals=bp * RESERVOIR,            # tanh
            bytes_accessed=bytes_accessed),
    )(x_bf, wr_bf, br2, w1_bf, b12, w2_bf, b22, w3_bf, b32)
    return out[:B]


def _reference(x, wr, br, w1, b1, w2, b2, w3, b3):
    """Plain-JAX reference with the same bf16-input / f32-accumulate recipe."""
    bf, f32 = jnp.bfloat16, jnp.float32
    r = jnp.tanh(jnp.dot(x.astype(bf), wr.astype(bf),
                         preferred_element_type=f32) + br)
    h = jnp.maximum(jnp.dot(r.astype(bf), w1.astype(bf),
                            preferred_element_type=f32) + b1, 0.0)
    z = jnp.dot(h.astype(bf), w2.astype(bf), preferred_element_type=f32) + b2
    s = jnp.dot(z.astype(bf), w3.astype(bf), preferred_element_type=f32) + b3
    return (s > 0.5).astype(f32)


def _init_params(key):
    """Deterministic init mimicking nn.Linear's Kaiming-uniform defaults."""
    ks = jax.random.split(key, 8)

    def lin(kw, kb, fan_in, fan_out):
        bound = 1.0 / float(fan_in) ** 0.5
        w = jax.random.uniform(kw, (fan_in, fan_out), jnp.float32, -bound, bound)
        b = jax.random.uniform(kb, (fan_out,), jnp.float32, -bound, bound)
        return w, b

    wr, br = lin(ks[0], ks[1], INPUT_SIZE, RESERVOIR)
    w1, b1 = lin(ks[2], ks[3], RESERVOIR, HIDDEN)
    w2, b2 = lin(ks[4], ks[5], HIDDEN, LATENT)
    w3, b3 = lin(ks[6], ks[7], LATENT, OUTPUT)
    return wr, br, w1, b1, w2, b2, w3, b3


if __name__ == "__main__":
    key = jax.random.PRNGKey(0)
    kx, kx2, kp = jax.random.split(key, 3)
    params = _init_params(kp)

    # small deterministic test batch
    batch = 8
    x = jax.random.normal(kx, (batch, INPUT_SIZE), jnp.float32)

    out = jax.block_until_ready(hybrid_liquid_model(x, *params))
    ref = _reference(x, *params)
    assert out.shape == (batch, OUTPUT)
    assert bool(jnp.all((out == 0.0) | (out == 1.0)))
    agree = float(jnp.mean((out == ref).astype(jnp.float32)))
    assert agree >= 0.995, f"spike agreement {agree}"

    # also exercise the multi-tile + padded-batch path once
    batch2 = 300
    x2 = jax.random.normal(kx2, (batch2, INPUT_SIZE), jnp.float32)
    out2 = jax.block_until_ready(hybrid_liquid_model(x2, *params))
    ref2 = _reference(x2, *params)
    assert out2.shape == (batch2, OUTPUT)
    agree2 = float(jnp.mean((out2 == ref2).astype(jnp.float32)))
    assert agree2 >= 0.995, f"spike agreement {agree2}"

    print("KERNEL_OK")
</pallas_src>

<mosaic_0001>
module attributes {stable_mosaic.version = 11 : i64} {
  func.func @_hybrid_kernel(%arg0: i32, %arg1: memref<8x784xbf16, #tpu.memory_space<vmem>>, %arg2: memref<784x784xbf16, #tpu.memory_space<vmem>>, %arg3: memref<1x784xf32, #tpu.memory_space<vmem>>, %arg4: memref<784x256xbf16, #tpu.memory_space<vmem>>, %arg5: memref<1x256xf32, #tpu.memory_space<vmem>>, %arg6: memref<256x128xbf16, #tpu.memory_space<vmem>>, %arg7: memref<1x128xf32, #tpu.memory_space<vmem>>, %arg8: memref<128x784xbf16, #tpu.memory_space<vmem>>, %arg9: memref<1x784xf32, #tpu.memory_space<vmem>>, %arg10: memref<8x784xf32, #tpu.memory_space<vmem>>) attributes {dimension_semantics = [#tpu.dimension_semantics<parallel>], iteration_bounds = array<i64: 1>, scalar_prefetch = 0 : i64, scratch_operands = 0 : i64, tpu.core_type = #tpu.core_type<tc>, window_params = [{transform_indices = @transform_0, window_bounds = array<i64: 8, 784>}, {pipeline_mode = #tpu.pipeline_mode<synchronous>, transform_indices = @transform_1, window_bounds = array<i64: 784, 784>}, {pipeline_mode = #tpu.pipeline_mode<synchronous>, transform_indices = @transform_2, window_bounds = array<i64: 1, 784>}, {pipeline_mode = #tpu.pipeline_mode<synchronous>, transform_indices = @transform_3, window_bounds = array<i64: 784, 256>}, {pipeline_mode = #tpu.pipeline_mode<synchronous>, transform_indices = @transform_4, window_bounds = array<i64: 1, 256>}, {pipeline_mode = #tpu.pipeline_mode<synchronous>, transform_indices = @transform_5, window_bounds = array<i64: 256, 128>}, {pipeline_mode = #tpu.pipeline_mode<synchronous>, transform_indices = @transform_6, window_bounds = array<i64: 1, 128>}, {pipeline_mode = #tpu.pipeline_mode<synchronous>, transform_indices = @transform_7, window_bounds = array<i64: 128, 784>}, {pipeline_mode = #tpu.pipeline_mode<synchronous>, transform_indices = @transform_8, window_bounds = array<i64: 1, 784>}, {transform_indices = @transform_9, window_bounds = array<i64: 8, 784>}]} {
    %c0 = arith.constant 0 : index
    %c0_0 = arith.constant 0 : index
    %0 = vector.load %arg1[%c0, %c0_0] : memref<8x784xbf16, #tpu.memory_space<vmem>>, vector<8x784xbf16>
    %c0_1 = arith.constant 0 : index
    %c0_2 = arith.constant 0 : index
    %1 = vector.load %arg2[%c0_1, %c0_2] : memref<784x784xbf16, #tpu.memory_space<vmem>>, vector<784x784xbf16>
    %cst = arith.constant dense<0.000000e+00> : vector<8x784xf32>
    %2 = tpu.matmul %0, %1, %cst {dimension_numbers = #tpu.dot_dimension_numbers<[1], [0], [0], [1], [0, 0, 1, 1], [], []>} : vector<8x784xbf16>, vector<784x784xbf16>, vector<8x784xf32> -> vector<8x784xf32>
    %c0_3 = arith.constant 0 : index
    %c0_4 = arith.constant 0 : index
    %3 = vector.load %arg3[%c0_3, %c0_4] : memref<1x784xf32, #tpu.memory_space<vmem>>, vector<1x784xf32>
    %4 = vector.broadcast %3 : vector<1x784xf32> to vector<8x784xf32>
    %5 = arith.addf %2, %4 : vector<8x784xf32>
    %6 = math.tanh %5 : vector<8x784xf32>
    %7 = arith.truncf %6 : vector<8x784xf32> to vector<8x784xbf16>
    %c0_5 = arith.constant 0 : index
    %c0_6 = arith.constant 0 : index
    %8 = vector.load %arg4[%c0_5, %c0_6] : memref<784x256xbf16, #tpu.memory_space<vmem>>, vector<784x256xbf16>
    %cst_7 = arith.constant dense<0.000000e+00> : vector<8x256xf32>
    %9 = tpu.matmul %7, %8, %cst_7 {dimension_numbers = #tpu.dot_dimension_numbers<[1], [0], [0], [1], [0, 0, 1, 1], [], []>} : vector<8x784xbf16>, vector<784x256xbf16>, vector<8x256xf32> -> vector<8x256xf32>
    %c0_8 = arith.constant 0 : index
    %c0_9 = arith.constant 0 : index
    %10 = vector.load %arg5[%c0_8, %c0_9] : memref<1x256xf32, #tpu.memory_space<vmem>>, vector<1x256xf32>
    %11 = vector.broadcast %10 : vector<1x256xf32> to vector<8x256xf32>
    %12 = arith.addf %9, %11 : vector<8x256xf32>
    %cst_10 = arith.constant 0.000000e+00 : f32
    %13 = vector.broadcast %cst_10 : f32 to vector<8x256xf32>
    %14 = arith.maximumf %12, %13 : vector<8x256xf32>
    %15 = arith.truncf %14 : vector<8x256xf32> to vector<8x256xbf16>
    %c0_11 = arith.constant 0 : index
    %c0_12 = arith.constant 0 : index
    %16 = vector.load %arg6[%c0_11, %c0_12] : memref<256x128xbf16, #tpu.memory_space<vmem>>, vector<256x128xbf16>
    %cst_13 = arith.constant dense<0.000000e+00> : vector<8x128xf32>
    %17 = tpu.matmul %15, %16, %cst_13 {dimension_numbers = #tpu.dot_dimension_numbers<[1], [0], [0], [1], [0, 0, 1, 1], [], []>} : vector<8x256xbf16>, vector<256x128xbf16>, vector<8x128xf32> -> vector<8x128xf32>
    %c0_14 = arith.constant 0 : index
    %c0_15 = arith.constant 0 : index
    %18 = vector.load %arg7[%c0_14, %c0_15] : memref<1x128xf32, #tpu.memory_space<vmem>>, vector<1x128xf32>
    %19 = vector.broadcast %18 : vector<1x128xf32> to vector<8x128xf32>
    %20 = arith.addf %17, %19 : vector<8x128xf32>
    %21 = arith.truncf %20 : vector<8x128xf32> to vector<8x128xbf16>
    %c0_16 = arith.constant 0 : index
    %c0_17 = arith.constant 0 : index
    %22 = vector.load %arg8[%c0_16, %c0_17] : memref<128x784xbf16, #tpu.memory_space<vmem>>, vector<128x784xbf16>
    %cst_18 = arith.constant dense<0.000000e+00> : vector<8x784xf32>
    %23 = tpu.matmul %21, %22, %cst_18 {dimension_numbers = #tpu.dot_dimension_numbers<[1], [0], [0], [1], [0, 0, 1, 1], [], []>} : vector<8x128xbf16>, vector<128x784xbf16>, vector<8x784xf32> -> vector<8x784xf32>
    %c0_19 = arith.constant 0 : index
    %c0_20 = arith.constant 0 : index
    %24 = vector.load %arg9[%c0_19, %c0_20] : memref<1x784xf32, #tpu.memory_space<vmem>>, vector<1x784xf32>
    %25 = vector.broadcast %24 : vector<1x784xf32> to vector<8x784xf32>
    %26 = arith.addf %23, %25 : vector<8x784xf32>
    %cst_21 = arith.constant 5.000000e-01 : f32
    %27 = vector.broadcast %cst_21 : f32 to vector<8x784xf32>
    %28 = arith.cmpf ogt, %26, %27 : vector<8x784xf32>
    %29 = arith.extui %28 : vector<8x784xi1> to vector<8x784xi32>
    %30 = arith.sitofp %29 : vector<8x784xi32> to vector<8x784xf32>
    %c0_22 = arith.constant 0 : index
    %c0_23 = arith.constant 0 : index
    %31 = vector.load %arg10[%c0_22, %c0_23] : memref<8x784xf32, #tpu.memory_space<vmem>>, vector<8x784xf32>
    tpu.vector_store %arg10[%c0_22, %c0_23], %30 {strides = array<i32>} : memref<8x784xf32, #tpu.memory_space<vmem>>, vector<8x784xf32>,
    return
  }
  func.func @transform_0(%arg0: i32) -> (i32, i32) {
    %c0_i32 = arith.constant 0 : i32
    %c0_i32_0 = arith.constant 0 : i32
    return %arg0, %c0_i32 : i32, i32
  }
  func.func @transform_1(%arg0: i32) -> (i32, i32) {
    %c0_i32 = arith.constant 0 : i32
    %c0_i32_0 = arith.constant 0 : i32
    %c0_i32_1 = arith.constant 0 : i32
    return %c0_i32, %c0_i32_0 : i32, i32
  }
  func.func @transform_2(%arg0: i32) -> (i32, i32) {
    %c0_i32 = arith.constant 0 : i32
    %c0_i32_0 = arith.constant 0 : i32
    %c0_i32_1 = arith.constant 0 : i32
    return %c0_i32, %c0_i32_0 : i32, i32
  }
  func.func @transform_3(%arg0: i32) -> (i32, i32) {
    %c0_i32 = arith.constant 0 : i32
    %c0_i32_0 = arith.constant 0 : i32
    %c0_i32_1 = arith.constant 0 : i32
    return %c0_i32, %c0_i32_0 : i32, i32
  }
  func.func @transform_4(%arg0: i32) -> (i32, i32) {
    %c0_i32 = arith.constant 0 : i32
    %c0_i32_0 = arith.constant 0 : i32
    %c0_i32_1 = arith.constant 0 : i32
    return %c0_i32, %c0_i32_0 : i32, i32
  }
  func.func @transform_5(%arg0: i32) -> (i32, i32) {
    %c0_i32 = arith.constant 0 : i32
    %c0_i32_0 = arith.constant 0 : i32
    %c0_i32_1 = arith.constant 0 : i32
    return %c0_i32, %c0_i32_0 : i32, i32
  }
  func.func @transform_6(%arg0: i32) -> (i32, i32) {
    %c0_i32 = arith.constant 0 : i32
    %c0_i32_0 = arith.constant 0 : i32
    %c0_i32_1 = arith.constant 0 : i32
    return %c0_i32, %c0_i32_0 : i32, i32
  }
  func.func @transform_7(%arg0: i32) -> (i32, i32) {
    %c0_i32 = arith.constant 0 : i32
    %c0_i32_0 = arith.constant 0 : i32
    %c0_i32_1 = arith.constant 0 : i32
    return %c0_i32, %c0_i32_0 : i32, i32
  }
  func.func @transform_8(%arg0: i32) -> (i32, i32) {
    %c0_i32 = arith.constant 0 : i32
    %c0_i32_0 = arith.constant 0 : i32
    %c0_i32_1 = arith.constant 0 : i32
    return %c0_i32, %c0_i32_0 : i32, i32
  }
  func.func @transform_9(%arg0: i32) -> (i32, i32) {
    %c0_i32 = arith.constant 0 : i32
    %c0_i32_0 = arith.constant 0 : i32
    return %arg0, %c0_i32 : i32, i32
  }
}

</mosaic_0001>

<bundles_post_ra>
// kernel: tpu_custom_call.1
= control target key start
LH: loop header
LB: loop body
LE: loop exit
PB: predicated region body
PF: predicated region fallthrough
CT: control target
= control target key end

     0   :  { %14 = vsyncpa [#allocation3], 0  ;;  %s6757_s0 = inlined_call_operand.hbm [shape: bf16[8,784], index: 0, kind: input, shape index: {}]   ;;  %s6758_s1 = inlined_call_operand.hbm [shape: bf16[784,784], index: 1, kind: input, shape index: {}]   ;;  %s6759_s2 = inlined_call_operand.hbm [shape: f32[1,784], index: 2, kind: input, shape index: {}]   ;;  %s6760_s3 = inlined_call_operand.hbm [shape: bf16[784,256], index: 3, kind: input, shape index: {}]   ;;  %s6761_s4 = inlined_call_operand.hbm [shape: f32[1,256], index: 4, kind: input, shape index: {}]   ;;  %s6762_s5 = inlined_call_operand.hbm [shape: bf16[256,128], index: 5, kind: input, shape index: {}]   ;;  %s6763_s6 = inlined_call_operand.hbm [shape: f32[1,128], index: 6, kind: input, shape index: {}]   ;;  %s6764_s7 = inlined_call_operand.vmem [shape: bf16[128,784], index: 7, kind: input, shape index: {}]   ;;  %s6765_s8 = inlined_call_operand.hbm [shape: f32[1,784], index: 8, kind: input, shape index: {}]   ;;  %s6766_s9 = inlined_call_operand.hbm [shape: f32[8,784], index: 9, kind: output, shape index: {}]  }
   0x1   :  { %15 = vsyncpa [#allocation6], 0 }
   0x2   :  { %16 = vsyncpa [#allocation9], 0 }
   0x3   :  { %17 = vsyncpa [#allocation12], 0 }
   0x4   :  { %18 = vsyncpa [#allocation15], 0 }
   0x5   :  { %19 = vsyncpa [#allocation4], 0  ;;  %s6267_s30 = smov [#allocation5]   ;;  %s6057_s13 = scalar_lea.hbm %s6758_s1, 43904 }
   0x6   :  { %s35_s10 = sshll.u32 %s6267_s30, 4  ;;  %p6058_p0 = scmp.ne.s32.totalorder %s6758_s1, %s6057_s13  ;;  %s36_s10 = int_to_ptr.vmem [resolvable:$true] %s35_s10 }
   0x7   :  { %p6061_p1 = scmp.lt.u32.totalorder %s6057_s13, %s6758_s1 }
   0x9   :  { %p6063_p2 = pnand %p6061_p1, %p6058_p0 }
   0xb   :  { %6066 = shalt.err (!%p6063_p2)
}
   0xc   :  { %s6067_s18 = scalar_lea.vmem %s36_s10, 43904  ;;  %p6072_p4 = scmp.lt.s32.totalorder %s36_s10, %s36_s10 }
   0xd   :  { %p6068_p3 = scmp.ne.s32.totalorder %s36_s10, %s6067_s18  ;;  %p6073_p5 = scmp.lt.s32.totalorder %s6067_s18, %s6067_s18 }
   0xf   :  { %p6074_p6 = por %p6073_p5, %p6072_p4 }
  0x11   :  { %p6075_p7 = pnand %p6074_p6, %p6068_p3 }
  0x13   :  { %6078 = shalt.err (!%p6075_p7)
}
  0x14   :  { %s6268_s19 = smov 448   ;;  %s6269_s20 = smov 28  }
  0x15   :  { %41 = dma.hbm_to_vmem [thread:$0]  %s6758_s1, 43904, %s36_s10, [#allocation6], %s6268_s19, %s6268_s19, %s6269_s20  }
  0x16   :  { %s6270_s23 = smov [#allocation8]   ;;  %s6079_s27 = scalar_lea.hbm %s6760_s3, 12544 }
  0x17   :  { %s57_s24 = sshll.u32 %s6270_s23, 4  ;;  %p6080_p8 = scmp.ne.s32.totalorder %s6760_s3, %s6079_s27  ;;  %s58_s24 = int_to_ptr.vmem [resolvable:$true] %s57_s24 }
  0x18   :  { %p6083_p9 = scmp.lt.u32.totalorder %s6079_s27, %s6760_s3 }
  0x1a   :  { %p6085_p10 = pnand %p6083_p9, %p6080_p8 }
  0x1c   :  { %6088 = shalt.err (!%p6085_p10)
}
  0x1d   :  { %s6089_s12 = scalar_lea.vmem %s58_s24, 12544  ;;  %p6094_p12 = scmp.lt.s32.totalorder %s58_s24, %s58_s24 }
  0x1e   :  { %p6090_p11 = scmp.ne.s32.totalorder %s58_s24, %s6089_s12  ;;  %p6095_p13 = scmp.lt.s32.totalorder %s6089_s12, %s6089_s12 }
  0x20   :  { %p6096_p0 = por %p6095_p13, %p6094_p12 }
  0x22   :  { %p6097_p1 = pnand %p6096_p0, %p6090_p11 }
  0x24   :  { %6100 = shalt.err (!%p6097_p1)
}
  0x25   :  { %s6271_s1 = smov 128   ;;  %s6272_s10 = smov 8  }
  0x26   :  { %63 = dma.hbm_to_vmem [thread:$0]  %s6760_s3, 12544, %s58_s24, [#allocation9], %s6271_s1, %s6271_s1, %s6272_s10  }
  0x27   :  { %s6273_s15 = smov [#allocation11]   ;;  %s6101_s19 = scalar_lea.hbm %s6762_s5, 2048 }
  0x28   :  { %s79_s16 = sshll.u32 %s6273_s15, 4  ;;  %p6102_p2 = scmp.ne.s32.totalorder %s6762_s5, %s6101_s19  ;;  %s80_s16 = int_to_ptr.vmem [resolvable:$true] %s79_s16 }
  0x29   :  { %p6105_p3 = scmp.lt.u32.totalorder %s6101_s19, %s6762_s5 }
  0x2b   :  { %p6107_p4 = pnand %p6105_p3, %p6102_p2 }
  0x2d   :  { %6110 = shalt.err (!%p6107_p4)
}
  0x2e   :  { %s6111_s25 = scalar_lea.vmem %s80_s16, 2048  ;;  %p6116_p6 = scmp.lt.s32.totalorder %s80_s16, %s80_s16 }
  0x2f   :  { %p6112_p5 = scmp.ne.s32.totalorder %s80_s16, %s6111_s25  ;;  %p6117_p7 = scmp.lt.s32.totalorder %s6111_s25, %s6111_s25 }
  0x31   :  { %p6118_p8 = por %p6117_p7, %p6116_p6 }
  0x33   :  { %p6119_p9 = pnand %p6118_p8, %p6112_p5 }
  0x35   :  { %6122 = shalt.err (!%p6119_p9)
}
  0x36   :  { %s6274_s3 = smov 64   ;;  %s6275_s24 = smov 4  }
  0x37   :  { %85 = dma.hbm_to_vmem [thread:$0]  %s6762_s5, 2048, %s80_s16, [#allocation12], %s6274_s3, %s6274_s3, %s6275_s24  }
  0x38   :  { %s6276_s28 = smov [#allocation2]   ;;  %s6277_s30 = smov [#allocation7]  }
  0x39   :  { %s26_s29 = sshll.u32 %s6276_s28, 4  ;;  %s48_s11 = sshll.u32 %s6277_s30, 4  ;;  %s27_s29 = int_to_ptr.vmem [resolvable:$true] %s26_s29  ;;  %s49_s11 = int_to_ptr.vmem [resolvable:$true] %s48_s11 }
  0x3a   :  { %s6123_s10 = scalar_lea.hbm %s6757_s0, 448 }
  0x3b   :  { %p6124_p10 = scmp.ne.s32.totalorder %s6757_s0, %s6123_s10  ;;  %p6127_p11 = scmp.lt.u32.totalorder %s6123_s10, %s6757_s0 }
  0x3d   :  { %p6129_p12 = pnand %p6127_p11, %p6124_p10 }
  0x3f   :  { %6132 = shalt.err (!%p6129_p12)
}
  0x40   :  { %s6133_s5 = scalar_lea.vmem %s27_s29, 448  ;;  %p6138_p0 = scmp.lt.s32.totalorder %s27_s29, %s27_s29 }
  0x41   :  { %p6134_p13 = scmp.ne.s32.totalorder %s27_s29, %s6133_s5  ;;  %p6139_p1 = scmp.lt.s32.totalorder %s6133_s5, %s6133_s5 }
  0x43   :  { %p6140_p2 = por %p6139_p1, %p6138_p0 }
  0x45   :  { %p6141_p3 = pnand %p6140_p2, %p6134_p13 }
  0x47   :  { %6144 = shalt.err (!%p6141_p3)
}
  0x48   :  { %29 = dma.hbm_to_vmem [thread:$0]  %s6757_s0, 448, %s27_s29, [#allocation3]  }
  0x49   :  { %s6145_s21 = scalar_lea.hbm %s6759_s2, 112 }
  0x4a   :  { %p6146_p4 = scmp.ne.s32.totalorder %s6759_s2, %s6145_s21  ;;  %p6149_p5 = scmp.lt.u32.totalorder %s6145_s21, %s6759_s2 }
  0x4c   :  { %p6151_p6 = pnand %p6149_p5, %p6146_p4 }
  0x4e   :  { %6154 = shalt.err (!%p6151_p6)
}
  0x4f   :  { %s6155_s24 = scalar_lea.vmem %s49_s11, 112  ;;  %s6159_s26 = scalar_lea.vmem %s49_s11, 128 }
  0x50   :  { %p6156_p7 = scmp.ne.s32.totalorder %s49_s11, %s6155_s24  ;;  %p6160_p8 = scmp.lt.s32.totalorder %s49_s11, %s49_s11 }
  0x51   :  { %p6161_p9 = scmp.lt.s32.totalorder %s6159_s26, %s6155_s24 }
  0x53   :  { %p6162_p10 = por %p6161_p9, %p6160_p8 }
  0x55   :  { %p6163_p11 = pnand %p6162_p10, %p6156_p7 }
  0x57   :  { %6166 = shalt.err (!%p6163_p11)
}
  0x58   :  { %51 = dma.hbm_to_vmem [thread:$0]  %s6759_s2, 112, %s49_s11, [#allocation6]  }
  0x59   :  { %s6278_s28 = smov [#allocation10]   ;;  %s6279_s30 = smov [#allocation13]  }
  0x5a   :  { %s70_s29 = sshll.u32 %s6278_s28, 4  ;;  %s92_s12 = sshll.u32 %s6279_s30, 4  ;;  %s71_s29 = int_to_ptr.vmem [resolvable:$true] %s70_s29  ;;  %s93_s12 = int_to_ptr.vmem [resolvable:$true] %s92_s12 }
  0x5b   :  { %s6167_s13 = scalar_lea.hbm %s6761_s4, 32 }
  0x5c   :  { %p6168_p12 = scmp.ne.s32.totalorder %s6761_s4, %s6167_s13  ;;  %p6171_p13 = scmp.lt.u32.totalorder %s6167_s13, %s6761_s4 }
  0x5e   :  { %p6173_p0 = pnand %p6171_p13, %p6168_p12 }
  0x60   :  { %6176 = shalt.err (!%p6173_p0)
}
  0x61   :  { %s6177_s2 = scalar_lea.vmem %s71_s29, 32  ;;  %p6182_p2 = scmp.lt.s32.totalorder %s71_s29, %s71_s29 }
  0x62   :  { %p6178_p1 = scmp.ne.s32.totalorder %s71_s29, %s6177_s2  ;;  %p6183_p3 = scmp.lt.s32.totalorder %s6177_s2, %s6177_s2 }
  0x64   :  { %p6184_p4 = por %p6183_p3, %p6182_p2 }
  0x66   :  { %p6185_p5 = pnand %p6184_p4, %p6178_p1 }
  0x68   :  { %6188 = shalt.err (!%p6185_p5)
}
  0x69   :  { %73 = dma.hbm_to_vmem [thread:$0]  %s6761_s4, 32, %s71_s29, [#allocation9]  }
  0x6a   :  { %s6189_s20 = scalar_lea.hbm %s6763_s6, 16 }
  0x6b   :  { %p6190_p6 = scmp.ne.s32.totalorder %s6763_s6, %s6189_s20  ;;  %p6193_p7 = scmp.lt.u32.totalorder %s6189_s20, %s6763_s6 }
  0x6d   :  { %p6195_p8 = pnand %p6193_p7, %p6190_p6 }
  0x6f   :  { %6198 = shalt.err (!%p6195_p8)
}
  0x70   :  { %s6199_s3 = scalar_lea.vmem %s93_s12, 16  ;;  %s6203_s24 = scalar_lea.vmem %s93_s12, 32 }
  0x71   :  { %p6200_p9 = scmp.ne.s32.totalorder %s93_s12, %s6199_s3  ;;  %p6204_p10 = scmp.lt.s32.totalorder %s93_s12, %s93_s12 }
  0x72   :  { %p6205_p11 = scmp.lt.s32.totalorder %s6203_s24, %s6199_s3 }
  0x74   :  { %p6206_p12 = por %p6205_p11, %p6204_p10 }
  0x76   :  { %p6207_p13 = pnand %p6206_p12, %p6200_p9 }
  0x78   :  { %6210 = shalt.err (!%p6207_p13)
}
  0x79   :  { %95 = dma.hbm_to_vmem [thread:$0]  %s6763_s6, 16, %s93_s12, [#allocation12]  }
  0x7a   :  { %s6280_s0 = smov [#allocation14]   ;;  %s6211_s30 = scalar_lea.hbm %s6765_s8, 112 }
  0x7b   :  { %s104_s27 = sshll.u32 %s6280_s0, 4  ;;  %p6212_p0 = scmp.ne.s32.totalorder %s6765_s8, %s6211_s30  ;;  %s105_s27 = int_to_ptr.vmem [resolvable:$true] %s104_s27 }
  0x7c   :  { %p6215_p1 = scmp.lt.u32.totalorder %s6211_s30, %s6765_s8 }
  0x7e   :  { %p6217_p2 = pnand %p6215_p1, %p6212_p0 }
  0x80   :  { %6220 = shalt.err (!%p6217_p2)
}
  0x81   :  { %s6221_s15 = scalar_lea.vmem %s105_s27, 112  ;;  %s6225_s6 = scalar_lea.vmem %s105_s27, 128 }
  0x82   :  { %p6222_p3 = scmp.ne.s32.totalorder %s105_s27, %s6221_s15  ;;  %p6226_p4 = scmp.lt.s32.totalorder %s105_s27, %s105_s27 }
  0x83   :  { %p6227_p5 = scmp.lt.s32.totalorder %s6225_s6, %s6221_s15 }
  0x85   :  { %p6228_p6 = por %p6227_p5, %p6226_p4 }
  0x87   :  { %p6229_p7 = pnand %p6228_p6, %p6222_p3 }
  0x89   :  { %6232 = shalt.err (!%p6229_p7)
}
  0x8a   :  { %107 = dma.hbm_to_vmem [thread:$0]  %s6765_s8, 112, %s105_s27, [#allocation15]  }
  0x8b   :  { %6255 = dma.done.wait [#allocation3], 448  }
  0x8c   :  { %6256 = vsyncadd [#allocation3], 4294966848 }
  0x8d   :  { %6257 = dma.done.wait [#allocation6], 44016  }
  0x8e   :  { %6258 = vsyncadd [#allocation6], 4294923280 }
  0x8f   :  { %6259 = dma.done.wait [#allocation9], 12576  }
  0x90   :  { %6260 = vsyncadd [#allocation9], 4294954720 }
  0x91   :  { %6261 = dma.done.wait [#allocation12], 2064  }
  0x92   :  { %6262 = vsyncadd [#allocation12], 4294965232 }
  0x93   :  { %6263 = dma.done.wait [#allocation15], 112  }
  0x94   :  { %6264 = vsyncadd [#allocation15], 4294967184  ;;  %v5302_v0 = vld [vmem:[#allocation5 + $0x4] ss:$28 sps:$4 sm:$0xff]   ;;  %v5304_v1 = vld [vmem:[#allocation5 + $0xc] ss:$28 sps:$4 sm:$0xff]  }
  0x95   :  { %2358 = vmatprep.subr.bf16.mxu0 %v5302_v0  ;;  %v5306_v2 = vld [vmem:[#allocation5] ss:$28 sps:$4 sm:$0xff]   ;;  %v5307_v3 = vld [vmem:[#allocation5 + $0x8] ss:$28 sps:$4 sm:$0xff]   ;;  %2522 = vmatprep.subr.bf16.mxu1 %v5304_v1  ;;  %v5312_v6 = vld [vmem:[#allocation5 + $0x38] ss:$28 sps:$4 sm:$0xff]  }
  0x96   :  { %v5308_v4 = vld [vmem:[#allocation5 + $0x3c] ss:$28 sps:$4 sm:$0xff]   ;;  %2359 = vmatpush1.bf16.msra.mxu0 %v5306_v2  ;;  %2523 = vmatpush1.bf16.msra.mxu1 %v5307_v3  ;;  %v5310_v5 = vld [vmem:[#allocation5 + $0x44] ss:$28 sps:$4 sm:$0xff]   ;;  %v5314_v8 = vld [vmem:[#allocation5 + $0x74] ss:$28 sps:$4 sm:$0xff]  }
  0x97   :  { %2360 = vmatprep.subr.bf16.mxu0 %v5308_v4  ;;  %v5313_v7 = vld [vmem:[#allocation5 + $0x40] ss:$28 sps:$4 sm:$0xff]   ;;  %2524 = vmatprep.subr.bf16.mxu1 %v5310_v5  ;;  %v5318_v10 = vld [vmem:[#allocation5 + $0x70] ss:$28 sps:$4 sm:$0xff]   ;;  %v5319_v11 = vld [vmem:[#allocation5 + $0x78] ss:$28 sps:$4 sm:$0xff]  }
  0x98   :  { %v5316_v9 = vld [vmem:[#allocation5 + $0x7c] ss:$28 sps:$4 sm:$0xff]   ;;  %v5320_v12 = vld [vmem:[#allocation5 + $0xac] ss:$28 sps:$4 sm:$0xff]   ;;  %v5322_v13 = vld [vmem:[#allocation5 + $0xb4] ss:$28 sps:$4 sm:$0xff]  }
  0x99   :  { %v5324_v14 = vld [vmem:[#allocation5 + $0xa8] ss:$28 sps:$4 sm:$0xff]   ;;  %v5325_v15 = vld [vmem:[#allocation5 + $0xb0] ss:$28 sps:$4 sm:$0xff]   ;;  %v5330_v18 = vld [vmem:[#allocation5 + $0xe0] ss:$28 sps:$4 sm:$0xff]  }
  0x9a   :  { %2361 = vmatpush1.bf16.msra.mxu0 %v5312_v6  ;;  %2525 = vmatpush1.bf16.msra.mxu1 %v5313_v7  ;;  %v5326_v16 = vld [vmem:[#allocation5 + $0xe4] ss:$28 sps:$4 sm:$0xff]   ;;  %v5328_v17 = vld [vmem:[#allocation5 + $0xec] ss:$28 sps:$4 sm:$0xff]   ;;  %v5332_v20 = vld [vmem:[#allocation5 + $0x11c] ss:$28 sps:$4 sm:$0xff]  }
  0x9b   :  { %2362 = vmatprep.subr.bf16.mxu0 %v5314_v8  ;;  %2526 = vmatprep.subr.bf16.mxu1 %v5316_v9  ;;  %v5331_v19 = vld [vmem:[#allocation5 + $0xe8] ss:$28 sps:$4 sm:$0xff]   ;;  %v5336_v22 = vld [vmem:[#allocation5 + $0x118] ss:$28 sps:$4 sm:$0xff]   ;;  %v5337_v23 = vld [vmem:[#allocation5 + $0x120] ss:$28 sps:$4 sm:$0xff]  }
  0x9c   :  { %v5334_v21 = vld [vmem:[#allocation5 + $0x124] ss:$28 sps:$4 sm:$0xff]   ;;  %v5338_v24 = vld [vmem:[#allocation5 + $0x154] ss:$28 sps:$4 sm:$0xff]   ;;  %v5340_v25 = vld [vmem:[#allocation5 + $0x15c] ss:$28 sps:$4 sm:$0xff]  }
  0x9d   :  { %v5342_v26 = vld [vmem:[#allocation5 + $0x150] ss:$28 sps:$4 sm:$0xff]   ;;  %v5343_v27 = vld [vmem:[#allocation5 + $0x158] ss:$28 sps:$4 sm:$0xff]   ;;  %v5348_v30 = vld [vmem:[#allocation5 + $0x188] ss:$28 sps:$4 sm:$0xff]  }
  0x9e   :  { %2363 = vmatpush1.bf16.msra.mxu0 %v5318_v10  ;;  %2527 = vmatpush1.bf16.msra.mxu1 %v5319_v11  ;;  %v5344_v28 = vld [vmem:[#allocation5 + $0x18c] ss:$28 sps:$4 sm:$0xff]   ;;  %v5346_v29 = vld [vmem:[#allocation5 + $0x194] ss:$28 sps:$4 sm:$0xff]   ;;  %v5350_v32 = vld [vmem:[#allocation5 + $0x1c4] ss:$28 sps:$4 sm:$0xff]  }
  0x9f   :  { %2364 = vmatprep.subr.bf16.mxu0 %v5320_v12  ;;  %2528 = vmatprep.subr.bf16.mxu1 %v5322_v13  ;;  %v5349_v31 = vld [vmem:[#allocation5 + $0x190] ss:$28 sps:$4 sm:$0xff]   ;;  %v5354_v34 = vld [vmem:[#allocation5 + $0x1c0] ss:$28 sps:$4 sm:$0xff]   ;;  %v5355_v35 = vld [vmem:[#allocation5 + $0x1c8] ss:$28 sps:$4 sm:$0xff]  }
  0xa0   :  { %v5352_v33 = vld [vmem:[#allocation5 + $0x1cc] ss:$28 sps:$4 sm:$0xff]   ;;  %v5356_v36 = vld [vmem:[#allocation5 + $0x1fc] ss:$28 sps:$4 sm:$0xff]   ;;  %v5358_v37 = vld [vmem:[#allocation5 + $0x204] ss:$28 sps:$4 sm:$0xff]  }
  0xa1   :  { %v5360_v38 = vld [vmem:[#allocation5 + $0x1f8] ss:$28 sps:$4 sm:$0xff]   ;;  %v5361_v39 = vld [vmem:[#allocation5 + $0x200] ss:$28 sps:$4 sm:$0xff]   ;;  %v5366_v42 = vld [vmem:[#allocation5 + $0x230] ss:$28 sps:$4 sm:$0xff]  }
  0xa2   :  { %2365 = vmatpush1.bf16.msra.mxu0 %v5324_v14  ;;  %2529 = vmatpush1.bf16.msra.mxu1 %v5325_v15  ;;  %v5362_v40 = vld [vmem:[#allocation5 + $0x234] ss:$28 sps:$4 sm:$0xff]   ;;  %v5364_v41 = vld [vmem:[#allocation5 + $0x23c] ss:$28 sps:$4 sm:$0xff]   ;;  %v5368_v44 = vld [vmem:[#allocation5 + $0x26c] ss:$28 sps:$4 sm:$0xff]  }
  0xa3   :  { %2366 = vmatprep.subr.bf16.mxu0 %v5326_v16  ;;  %2530 = vmatprep.subr.bf16.mxu1 %v5328_v17  ;;  %v5367_v43 = vld [vmem:[#allocation5 + $0x238] ss:$28 sps:$4 sm:$0xff]   ;;  %v133_v46 = vld [vmem:[#allocation2] sm:$0xff]  ;;  %v5373_v49 = vld [vmem:[#allocation5 + $0x270] ss:$28 sps:$4 sm:$0xff]   ;;  %vm2354_vm0 = vcmask 130048  }
  0xa4   :  { %v5370_v45 = vld [vmem:[#allocation5 + $0x274] ss:$28 sps:$4 sm:$0xff]   ;;  %v5372_v47 = vld [vmem:[#allocation5 + $0x268] ss:$28 sps:$4 sm:$0xff]   ;;  %v6431_v48 = vcombine.high %v133_v46, %v133_v46  ;;  %v5378_v52 = vld [vmem:[#allocation5 + $0x2a0] ss:$28 sps:$4 sm:$0xff]   ;;  %v6435_v5 = vcombine.low %v133_v46, %v133_v46 }
  0xa5   :  { %v5374_v50 = vld [vmem:[#allocation5 + $0x2a4] ss:$28 sps:$4 sm:$0xff]   ;;  %v5376_v51 = vld [vmem:[#allocation5 + $0x2ac] ss:$28 sps:$4 sm:$0xff]   ;;  %v5380_v54 = vld [vmem:[#allocation5 + $0x2dc] ss:$28 sps:$4 sm:$0xff]  }
  0xa6   :  { %2367 = vmatpush1.bf16.msra.mxu0 %v5330_v18  ;;  %2531 = vmatpush1.bf16.msra.mxu1 %v5331_v19  ;;  %v5379_v53 = vld [vmem:[#allocation5 + $0x2a8] ss:$28 sps:$4 sm:$0xff]   ;;  %v5384_v56 = vld [vmem:[#allocation5 + $0x2d8] ss:$28 sps:$4 sm:$0xff]   ;;  %v5385_v57 = vld [vmem:[#allocation5 + $0x2e0] ss:$28 sps:$4 sm:$0xff]  }
  0xa7   :  { %2368 = vmatprep.subr.bf16.mxu0 %v5332_v20  ;;  %2532 = vmatprep.subr.bf16.mxu1 %v5334_v21  ;;  %v5382_v55 = vld [vmem:[#allocation5 + $0x2e4] ss:$28 sps:$4 sm:$0xff]   ;;  %v5386_v58 = vld [vmem:[#allocation5 + $0x314] ss:$28 sps:$4 sm:$0xff]   ;;  %v5388_v59 = vld [vmem:[#allocation5 + $0x31c] ss:$28 sps:$4 sm:$0xff]  }
  0xa8   :  { %2390 = vmatprep.mubr.bf16.mxu0 %v6431_v48  ;;  %2554 = vmatprep.mubr.bf16.mxu1 %v6431_v48  ;;  %v5390_v60 = vld [vmem:[#allocation5 + $0x310] ss:$28 sps:$4 sm:$0xff]   ;;  %v5391_v61 = vld [vmem:[#allocation5 + $0x318] ss:$28 sps:$4 sm:$0xff]   ;;  %v5396_v0 = vld [vmem:[#allocation5 + $0x348] ss:$28 sps:$4 sm:$0xff]  }
  0xa9   :  { %v5392_v62 = vld [vmem:[#allocation5 + $0x34c] ss:$28 sps:$4 sm:$0xff]   ;;  %v5394_v63 = vld [vmem:[#allocation5 + $0x354] ss:$28 sps:$4 sm:$0xff]   ;;  %v5401_v2 = vld [vmem:[#allocation5 + $0x384] ss:$28 sps:$4 sm:$0xff]  }
  0xaa   :  { %2369 = vmatpush1.bf16.msra.mxu0 %v5336_v22  ;;  %2533 = vmatpush1.bf16.msra.mxu1 %v5337_v23  ;;  %v5397_v1 = vld [vmem:[#allocation5 + $0x350] ss:$28 sps:$4 sm:$0xff]   ;;  %v5399_v4 = vld [vmem:[#allocation5 + $0x380] ss:$28 sps:$4 sm:$0xff]   ;;  %v5402_v6 = vld [vmem:[#allocation5 + $0x388] ss:$28 sps:$4 sm:$0xff]  }
  0xab   :  { %2370 = vmatprep.subr.bf16.mxu0 %v5338_v24  ;;  %2534 = vmatprep.subr.bf16.mxu1 %v5340_v25  ;;  %v5404_v3 = vld [vmem:[#allocation5 + $0x38c] ss:$28 sps:$4 sm:$0xff]   ;;  %v5408_v7 = vld [vmem:[#allocation5 + $0x3bc] ss:$28 sps:$4 sm:$0xff]   ;;  %v5411_v8 = vld [vmem:[#allocation5 + $0x3c4] ss:$28 sps:$4 sm:$0xff]  }
  0xac   :  { %v5406_v9 = vld [vmem:[#allocation5 + $0x3b8] ss:$28 sps:$4 sm:$0xff]   ;;  %v5409_v10 = vld [vmem:[#allocation5 + $0x3c0] ss:$28 sps:$4 sm:$0xff]   ;;  %v5412_v13 = vld [vmem:[#allocation5 + $0x3f0] ss:$28 sps:$4 sm:$0xff]  }
  0xad   :  { %v5414_v11 = vld [vmem:[#allocation5 + $0x3f4] ss:$28 sps:$4 sm:$0xff]   ;;  %v5417_v12 = vld [vmem:[#allocation5 + $0x3fc] ss:$28 sps:$4 sm:$0xff]   ;;  %v5420_v15 = vld [vmem:[#allocation5 + $0x42c] ss:$28 sps:$4 sm:$0xff]  }
  0xae   :  { %2371 = vmatpush1.bf16.msra.mxu0 %v5342_v26  ;;  %2535 = vmatpush1.bf16.msra.mxu1 %v5343_v27  ;;  %v5415_v14 = vld [vmem:[#allocation5 + $0x3f8] ss:$28 sps:$4 sm:$0xff]   ;;  %v5418_v17 = vld [vmem:[#allocation5 + $0x428] ss:$28 sps:$4 sm:$0xff]   ;;  %v5421_v18 = vld [vmem:[#allocation5 + $0x430] ss:$28 sps:$4 sm:$0xff]  }
  0xaf   :  { %2372 = vmatprep.subr.bf16.mxu0 %v5344_v28  ;;  %2536 = vmatprep.subr.bf16.mxu1 %v5346_v29  ;;  %v5423_v16 = vld [vmem:[#allocation5 + $0x434] ss:$28 sps:$4 sm:$0xff]   ;;  %v5426_v19 = vld [vmem:[#allocation5 + $0x464] ss:$28 sps:$4 sm:$0xff]   ;;  %v5429_v20 = vld [vmem:[#allocation5 + $0x46c] ss:$28 sps:$4 sm:$0xff]  }
  0xb0   :  { %v5424_v21 = vld [vmem:[#allocation5 + $0x460] ss:$28 sps:$4 sm:$0xff]   ;;  %v5427_v22 = vld [vmem:[#allocation5 + $0x468] ss:$28 sps:$4 sm:$0xff]   ;;  %v5430_v25 = vld [vmem:[#allocation5 + $0x498] ss:$28 sps:$4 sm:$0xff]  }
  0xb1   :  { %v5432_v23 = vld [vmem:[#allocation5 + $0x49c] ss:$28 sps:$4 sm:$0xff]   ;;  %v5435_v24 = vld [vmem:[#allocation5 + $0x4a4] ss:$28 sps:$4 sm:$0xff]   ;;  %v5438_v27 = vld [vmem:[#allocation5 + $0x4d4] ss:$28 sps:$4 sm:$0xff]  }
  0xb2   :  { %2373 = vmatpush1.bf16.msra.mxu0 %v5348_v30  ;;  %2537 = vmatpush1.bf16.msra.mxu1 %v5349_v31  ;;  %v5433_v26 = vld [vmem:[#allocation5 + $0x4a0] ss:$28 sps:$4 sm:$0xff]   ;;  %v6439_v29 = vld [vmem:[#allocation2 + $0x8] sm:$0xff]  ;;  %vm6283_vm1 = vmmov 0  }
  0xb3   :  { %2374 = vmatprep.subr.bf16.mxu0 %v5350_v32  ;;  %2538 = vmatprep.subr.bf16.mxu1 %v5352_v33  ;;  %v5441_v28 = vld [vmem:[#allocation5 + $0x4dc] ss:$28 sps:$4 sm:$0xff]   ;;  %v6443_v30 = vcombine.high %v6439_v29, %v6439_v29  ;;  %v5436_v31 = vld [vmem:[#allocation5 + $0x4d0] ss:$28 sps:$4 sm:$0xff]  }
  0xb4   :  { %v5439_v32 = vld [vmem:[#allocation5 + $0x4d8] ss:$28 sps:$4 sm:$0xff]   ;;  %v5444_v33 = vld [vmem:[#allocation5 + $0x50c] ss:$28 sps:$4 sm:$0xff]  }
  0xb5   :  { %v5465_v46 = vld [vmem:[#allocation5 + $0x5bc] ss:$28 sps:$4 sm:$0xff]  }
  0xb6   :  { %2375 = vmatpush1.bf16.msra.mxu0 %v5354_v34  ;;  %2539 = vmatpush1.bf16.msra.mxu1 %v5355_v35  ;;  %v5447_v34 = vld [vmem:[#allocation5 + $0x514] ss:$28 sps:$4 sm:$0xff]   ;;  %v5442_v35 = vld [vmem:[#allocation5 + $0x508] ss:$28 sps:$4 sm:$0xff]  }
  0xb7   :  { %2376 = vmatprep.subr.bf16.mxu0 %v5356_v36  ;;  %2540 = vmatprep.subr.bf16.mxu1 %v5358_v37  ;;  %v5445_v36 = vld [vmem:[#allocation5 + $0x510] ss:$28 sps:$4 sm:$0xff]   ;;  %v5450_v37 = vld [vmem:[#allocation5 + $0x544] ss:$28 sps:$4 sm:$0xff]  }
  0xba   :  { %2377 = vmatpush1.bf16.msra.mxu0 %v5360_v38  ;;  %2541 = vmatpush1.bf16.msra.mxu1 %v5361_v39  ;;  %v5453_v38 = vld [vmem:[#allocation5 + $0x54c] ss:$28 sps:$4 sm:$0xff]   ;;  %v5448_v39 = vld [vmem:[#allocation5 + $0x540] ss:$28 sps:$4 sm:$0xff]  }
  0xbb   :  { %2378 = vmatprep.subr.bf16.mxu0 %v5362_v40  ;;  %2542 = vmatprep.subr.bf16.mxu1 %v5364_v41  ;;  %v5451_v40 = vld [vmem:[#allocation5 + $0x548] ss:$28 sps:$4 sm:$0xff]   ;;  %v5456_v41 = vld [vmem:[#allocation5 + $0x57c] ss:$28 sps:$4 sm:$0xff]  }
  0xbe   :  { %2379 = vmatpush1.bf16.msra.mxu0 %v5366_v42  ;;  %2543 = vmatpush1.bf16.msra.mxu1 %v5367_v43  ;;  %v5459_v42 = vld [vmem:[#allocation5 + $0x584] ss:$28 sps:$4 sm:$0xff]   ;;  %v5454_v43 = vld [vmem:[#allocation5 + $0x578] ss:$28 sps:$4 sm:$0xff]  }
  0xbf   :  { %2380 = vmatprep.subr.bf16.mxu0 %v5368_v44  ;;  %2544 = vmatprep.subr.bf16.mxu1 %v5370_v45  ;;  %v5457_v44 = vld [vmem:[#allocation5 + $0x580] ss:$28 sps:$4 sm:$0xff]   ;;  %v5462_v45 = vld [vmem:[#allocation5 + $0x5b4] ss:$28 sps:$4 sm:$0xff]  }
  0xc2   :  { %2381 = vmatpush1.bf16.msra.mxu0 %v5372_v47  ;;  %2545 = vmatpush1.bf16.msra.mxu1 %v5373_v49  ;;  %v5460_v47 = vld [vmem:[#allocation5 + $0x5b0] ss:$28 sps:$4 sm:$0xff]   ;;  %v5463_v49 = vld [vmem:[#allocation5 + $0x5b8] ss:$28 sps:$4 sm:$0xff]  }
  0xc3   :  { %2382 = vmatprep.subr.bf16.mxu0 %v5374_v50  ;;  %2546 = vmatprep.subr.bf16.mxu1 %v5376_v51  ;;  %v5468_v50 = vld [vmem:[#allocation5 + $0x5ec] ss:$28 sps:$4 sm:$0xff]   ;;  %v5471_v51 = vld [vmem:[#allocation5 + $0x5f4] ss:$28 sps:$4 sm:$0xff]  }
  0xc6   :  { %2383 = vmatpush1.bf16.msra.mxu0 %v5378_v52  ;;  %2547 = vmatpush1.bf16.msra.mxu1 %v5379_v53  ;;  %v5466_v52 = vld [vmem:[#allocation5 + $0x5e8] ss:$28 sps:$4 sm:$0xff]   ;;  %v5469_v53 = vld [vmem:[#allocation5 + $0x5f0] ss:$28 sps:$4 sm:$0xff]  }
  0xc7   :  { %2384 = vmatprep.subr.bf16.mxu0 %v5380_v54  ;;  %2548 = vmatprep.subr.bf16.mxu1 %v5382_v55  ;;  %v5474_v54 = vld [vmem:[#allocation5 + $0x624] ss:$28 sps:$4 sm:$0xff]   ;;  %v5477_v55 = vld [vmem:[#allocation5 + $0x62c] ss:$28 sps:$4 sm:$0xff]  }
  0xca   :  { %2385 = vmatpush1.bf16.msra.mxu0 %v5384_v56  ;;  %2549 = vmatpush1.bf16.msra.mxu1 %v5385_v57  ;;  %v5472_v56 = vld [vmem:[#allocation5 + $0x620] ss:$28 sps:$4 sm:$0xff]   ;;  %v5475_v57 = vld [vmem:[#allocation5 + $0x628] ss:$28 sps:$4 sm:$0xff]  }
  0xcb   :  { %2386 = vmatprep.subr.bf16.mxu0 %v5386_v58  ;;  %2550 = vmatprep.subr.bf16.mxu1 %v5388_v59  ;;  %v5480_v58 = vld [vmem:[#allocation5 + $0x65c] ss:$28 sps:$4 sm:$0xff]   ;;  %v5483_v59 = vld [vmem:[#allocation5 + $0x664] ss:$28 sps:$4 sm:$0xff]  }
  0xce   :  { %2387 = vmatpush1.bf16.msra.mxu0 %v5390_v60  ;;  %2551 = vmatpush1.bf16.msra.mxu1 %v5391_v61  ;;  %v5478_v60 = vld [vmem:[#allocation5 + $0x658] ss:$28 sps:$4 sm:$0xff]   ;;  %v5481_v61 = vld [vmem:[#allocation5 + $0x660] ss:$28 sps:$4 sm:$0xff]  }
  0xcf   :  { %2388 = vmatprep.subr.bf16.mxu0 %v5392_v62  ;;  %2552 = vmatprep.subr.bf16.mxu1 %v5394_v63  ;;  %v5486_v62 = vld [vmem:[#allocation5 + $0x694] ss:$28 sps:$4 sm:$0xff]   ;;  %v5489_v63 = vld [vmem:[#allocation5 + $0x69c] ss:$28 sps:$4 sm:$0xff]  }
  0xd2   :  { %2389 = vmatpush1.bf16.msra.mxu0 %v5396_v0  ;;  %2553 = vmatpush1.bf16.msra.mxu1 %v5397_v1  ;;  %v5484_v0 = vld [vmem:[#allocation5 + $0x690] ss:$28 sps:$4 sm:$0xff]   ;;  %v5487_v1 = vld [vmem:[#allocation5 + $0x698] ss:$28 sps:$4 sm:$0xff]  }
  0xd3   :  { %2399 = vmatprep.subr.bf16.mxu0 %v5401_v2  ;;  %2563 = vmatprep.subr.bf16.mxu1 %v5404_v3  ;;  %v5492_v2 = vld [vmem:[#allocation5 + $0x6cc] ss:$28 sps:$4 sm:$0xff]   ;;  %v5495_v3 = vld [vmem:[#allocation5 + $0x6d4] ss:$28 sps:$4 sm:$0xff]  }
  0xd5   :  { %2391 = vmatmul.mubr.bf16.vlgmr.msra.gmra.mrb[0].mxu0 %v6435_v5  ;;  %2555 = vmatmul.mubr.bf16.vlgmr.msra.gmra.mrb[0].mxu1 %v6435_v5 }
  0xd6   :  { %2400 = vmatpush1.bf16.msra.mxu0 %v5399_v4  ;;  %2564 = vmatpush1.bf16.msra.mxu1 %v5402_v6  ;;  %v5490_v4 = vld [vmem:[#allocation5 + $0x6c8] ss:$28 sps:$4 sm:$0xff]   ;;  %v5493_v6 = vld [vmem:[#allocation5 + $0x6d0] ss:$28 sps:$4 sm:$0xff]  }
  0xd7   :  { %2401 = vmatprep.subr.bf16.mxu0 %v5408_v7  ;;  %2565 = vmatprep.subr.bf16.mxu1 %v5411_v8  ;;  %v5499_v7 = vld [vmem:[#allocation5 + $0x704] ss:$28 sps:$4 sm:$0xff]   ;;  %v5502_v8 = vld [vmem:[#allocation5 + $0x70c] ss:$28 sps:$4 sm:$0xff]  }
  0xd8   :  { %2431 = vmatprep.mubr.bf16.mxu0 %v6443_v30  ;;  %2595 = vmatprep.mubr.bf16.mxu1 %v6443_v30 }
  0xda   :  { %2402 = vmatpush1.bf16.msra.mxu0 %v5406_v9  ;;  %2566 = vmatpush1.bf16.msra.mxu1 %v5409_v10  ;;  %v5497_v9 = vld [vmem:[#allocation5 + $0x700] ss:$28 sps:$4 sm:$0xff]   ;;  %v6449_v10 = vcombine.low %v6439_v29, %v6439_v29  ;;  %v5525_v29 = vld [vmem:[#allocation5 + $0x7e8] ss:$28 sps:$4 sm:$0xff]  }
  0xdb   :  { %2403 = vmatprep.subr.bf16.mxu0 %v5414_v11  ;;  %2567 = vmatprep.subr.bf16.mxu1 %v5417_v12  ;;  %v5500_v11 = vld [vmem:[#allocation5 + $0x708] ss:$28 sps:$4 sm:$0xff]   ;;  %v5506_v12 = vld [vmem:[#allocation5 + $0x73c] ss:$28 sps:$4 sm:$0xff]  }
  0xde   :  { %2404 = vmatpush1.bf16.msra.mxu0 %v5412_v13  ;;  %2568 = vmatpush1.bf16.msra.mxu1 %v5415_v14  ;;  %v6451_v13 = vld [vmem:[#allocation2 + $0x10] sm:$0xff]  ;;  %v5509_v14 = vld [vmem:[#allocation5 + $0x744] ss:$28 sps:$4 sm:$0xff]  }
  0xdf   :  { %2405 = vmatprep.subr.bf16.mxu0 %v5420_v15  ;;  %2569 = vmatprep.subr.bf16.mxu1 %v5423_v16  ;;  %v6455_v15 = vcombine.high %v6451_v13, %v6451_v13  ;;  %v5504_v16 = vld [vmem:[#allocation5 + $0x738] ss:$28 sps:$4 sm:$0xff]  }
  0xe2   :  { %2406 = vmatpush1.bf16.msra.mxu0 %v5418_v17  ;;  %2570 = vmatpush1.bf16.msra.mxu1 %v5421_v18  ;;  %v5507_v17 = vld [vmem:[#allocation5 + $0x740] ss:$28 sps:$4 sm:$0xff]   ;;  %v5512_v18 = vld [vmem:[#allocation5 + $0x774] ss:$28 sps:$4 sm:$0xff]  }
  0xe3   :  { %2407 = vmatprep.subr.bf16.mxu0 %v5426_v19  ;;  %2571 = vmatprep.subr.bf16.mxu1 %v5429_v20  ;;  %v5515_v19 = vld [vmem:[#allocation5 + $0x77c] ss:$28 sps:$4 sm:$0xff]   ;;  %v5510_v20 = vld [vmem:[#allocation5 + $0x770] ss:$28 sps:$4 sm:$0xff]  }
  0xe6   :  { %2408 = vmatpush1.bf16.msra.mxu0 %v5424_v21  ;;  %2572 = vmatpush1.bf16.msra.mxu1 %v5427_v22  ;;  %v5513_v21 = vld [vmem:[#allocation5 + $0x778] ss:$28 sps:$4 sm:$0xff]   ;;  %v5518_v22 = vld [vmem:[#allocation5 + $0x7ac] ss:$28 sps:$4 sm:$0xff]  }
  0xe7   :  { %2409 = vmatprep.subr.bf16.mxu0 %v5432_v23  ;;  %2573 = vmatprep.subr.bf16.mxu1 %v5435_v24  ;;  %v5521_v23 = vld [vmem:[#allocation5 + $0x7b4] ss:$28 sps:$4 sm:$0xff]   ;;  %v5516_v24 = vld [vmem:[#allocation5 + $0x7a8] ss:$28 sps:$4 sm:$0xff]  }
  0xea   :  { %2410 = vmatpush1.bf16.msra.mxu0 %v5430_v25  ;;  %2574 = vmatpush1.bf16.msra.mxu1 %v5433_v26  ;;  %v5519_v25 = vld [vmem:[#allocation5 + $0x7b0] ss:$28 sps:$4 sm:$0xff]   ;;  %v5524_v26 = vld [vmem:[#allocation5 + $0x7e4] ss:$28 sps:$4 sm:$0xff]  }
  0xeb   :  { %2411 = vmatprep.subr.bf16.mxu0 %v5438_v27  ;;  %2575 = vmatprep.subr.bf16.mxu1 %v5441_v28  ;;  %v5527_v27 = vld [vmem:[#allocation5 + $0x7ec] ss:$28 sps:$4 sm:$0xff]   ;;  %v5522_v28 = vld [vmem:[#allocation5 + $0x7e0] ss:$28 sps:$4 sm:$0xff]  }
  0xee   :  { %2412 = vmatpush1.bf16.msra.mxu0 %v5436_v31  ;;  %2576 = vmatpush1.bf16.msra.mxu1 %v5439_v32  ;;  %v5530_v31 = vld [vmem:[#allocation5 + $0x81c] ss:$28 sps:$4 sm:$0xff]   ;;  %v5533_v32 = vld [vmem:[#allocation5 + $0x824] ss:$28 sps:$4 sm:$0xff]  }
  0xef   :  { %2413 = vmatprep.subr.bf16.mxu0 %v5444_v33  ;;  %2577 = vmatprep.subr.bf16.mxu1 %v5447_v34  ;;  %v5528_v33 = vld [vmem:[#allocation5 + $0x818] ss:$28 sps:$4 sm:$0xff]   ;;  %v5531_v34 = vld [vmem:[#allocation5 + $0x820] ss:$28 sps:$4 sm:$0xff]  }
  0xf2   :  { %2414 = vmatpush1.bf16.msra.mxu0 %v5442_v35  ;;  %2578 = vmatpush1.bf16.msra.mxu1 %v5445_v36  ;;  %v5536_v35 = vld [vmem:[#allocation5 + $0x854] ss:$28 sps:$4 sm:$0xff]   ;;  %v5539_v36 = vld [vmem:[#allocation5 + $0x85c] ss:$28 sps:$4 sm:$0xff]  }
  0xf3   :  { %2415 = vmatprep.subr.bf16.mxu0 %v5450_v37  ;;  %2579 = vmatprep.subr.bf16.mxu1 %v5453_v38  ;;  %v5534_v37 = vld [vmem:[#allocation5 + $0x850] ss:$28 sps:$4 sm:$0xff]   ;;  %v5537_v38 = vld [vmem:[#allocation5 + $0x858] ss:$28 sps:$4 sm:$0xff]  }
  0xf6   :  { %2416 = vmatpush1.bf16.msra.mxu0 %v5448_v39  ;;  %2580 = vmatpush1.bf16.msra.mxu1 %v5451_v40  ;;  %v5542_v39 = vld [vmem:[#allocation5 + $0x88c] ss:$28 sps:$4 sm:$0xff]   ;;  %v5545_v40 = vld [vmem:[#allocation5 + $0x894] ss:$28 sps:$4 sm:$0xff]  }
  0xf7   :  { %2417 = vmatprep.subr.bf16.mxu0 %v5456_v41  ;;  %2581 = vmatprep.subr.bf16.mxu1 %v5459_v42  ;;  %v5540_v41 = vld [vmem:[#allocation5 + $0x888] ss:$28 sps:$4 sm:$0xff]   ;;  %v5543_v42 = vld [vmem:[#allocation5 + $0x890] ss:$28 sps:$4 sm:$0xff]  }
  0xfa   :  { %2418 = vmatpush1.bf16.msra.mxu0 %v5454_v43  ;;  %2582 = vmatpush1.bf16.msra.mxu1 %v5457_v44  ;;  %v5548_v43 = vld [vmem:[#allocation5 + $0x8c4] ss:$28 sps:$4 sm:$0xff]   ;;  %v5551_v44 = vld [vmem:[#allocation5 + $0x8cc] ss:$28 sps:$4 sm:$0xff]  }
  0xfb   :  { %2419 = vmatprep.subr.bf16.mxu0 %v5462_v45  ;;  %2583 = vmatprep.subr.bf16.mxu1 %v5465_v46  ;;  %v5546_v45 = vld [vmem:[#allocation5 + $0x8c0] ss:$28 sps:$4 sm:$0xff]   ;;  %v5549_v46 = vld [vmem:[#allocation5 + $0x8c8] ss:$28 sps:$4 sm:$0xff]  }
  0xfe   :  { %2420 = vmatpush1.bf16.msra.mxu0 %v5460_v47  ;;  %2584 = vmatpush1.bf16.msra.mxu1 %v5463_v49  ;;  %v5554_v47 = vld [vmem:[#allocation5 + $0x8fc] ss:$28 sps:$4 sm:$0xff]   ;;  %v5557_v49 = vld [vmem:[#allocation5 + $0x904] ss:$28 sps:$4 sm:$0xff]  }
  0xff   :  { %2421 = vmatprep.subr.bf16.mxu0 %v5468_v50  ;;  %2585 = vmatprep.subr.bf16.mxu1 %v5471_v51  ;;  %v5552_v50 = vld [vmem:[#allocation5 + $0x8f8] ss:$28 sps:$4 sm:$0xff]   ;;  %v5555_v51 = vld [vmem:[#allocation5 + $0x900] ss:$28 sps:$4 sm:$0xff]  }
 0x102   :  { %2422 = vmatpush1.bf16.msra.mxu0 %v5466_v52  ;;  %2586 = vmatpush1.bf16.msra.mxu1 %v5469_v53  ;;  %v5560_v52 = vld [vmem:[#allocation5 + $0x934] ss:$28 sps:$4 sm:$0xff]   ;;  %v5563_v53 = vld [vmem:[#allocation5 + $0x93c] ss:$28 sps:$4 sm:$0xff]  }
 0x103   :  { %2423 = vmatprep.subr.bf16.mxu0 %v5474_v54  ;;  %2587 = vmatprep.subr.bf16.mxu1 %v5477_v55  ;;  %v5558_v54 = vld [vmem:[#allocation5 + $0x930] ss:$28 sps:$4 sm:$0xff]   ;;  %v5561_v55 = vld [vmem:[#allocation5 + $0x938] ss:$28 sps:$4 sm:$0xff]  }
 0x106   :  { %2424 = vmatpush1.bf16.msra.mxu0 %v5472_v56  ;;  %2588 = vmatpush1.bf16.msra.mxu1 %v5475_v57  ;;  %v5566_v56 = vld [vmem:[#allocation5 + $0x96c] ss:$28 sps:$4 sm:$0xff]   ;;  %v5569_v57 = vld [vmem:[#allocation5 + $0x974] ss:$28 sps:$4 sm:$0xff]  }
 0x107   :  { %2425 = vmatprep.subr.bf16.mxu0 %v5480_v58  ;;  %2589 = vmatprep.subr.bf16.mxu1 %v5483_v59  ;;  %v5564_v58 = vld [vmem:[#allocation5 + $0x968] ss:$28 sps:$4 sm:$0xff]   ;;  %v5567_v59 = vld [vmem:[#allocation5 + $0x970] ss:$28 sps:$4 sm:$0xff]  }
 0x10a   :  { %2426 = vmatpush1.bf16.msra.mxu0 %v5478_v60  ;;  %2590 = vmatpush1.bf16.msra.mxu1 %v5481_v61  ;;  %v5572_v60 = vld [vmem:[#allocation5 + $0x9a4] ss:$28 sps:$4 sm:$0xff]   ;;  %v5575_v61 = vld [vmem:[#allocation5 + $0x9ac] ss:$28 sps:$4 sm:$0xff]  }
 0x10b   :  { %2427 = vmatprep.subr.bf16.mxu0 %v5486_v62  ;;  %2591 = vmatprep.subr.bf16.mxu1 %v5489_v63  ;;  %v5570_v62 = vld [vmem:[#allocation5 + $0x9a0] ss:$28 sps:$4 sm:$0xff]   ;;  %v5573_v63 = vld [vmem:[#allocation5 + $0x9a8] ss:$28 sps:$4 sm:$0xff]  }
 0x10e   :  { %2428 = vmatpush1.bf16.msra.mxu0 %v5484_v0  ;;  %2592 = vmatpush1.bf16.msra.mxu1 %v5487_v1  ;;  %v5578_v0 = vld [vmem:[#allocation5 + $0x9dc] ss:$28 sps:$4 sm:$0xff]   ;;  %v5581_v1 = vld [vmem:[#allocation5 + $0x9e4] ss:$28 sps:$4 sm:$0xff]  }
 0x10f   :  { %2429 = vmatprep.subr.bf16.mxu0 %v5492_v2  ;;  %2593 = vmatprep.subr.bf16.mxu1 %v5495_v3  ;;  %v5576_v2 = vld [vmem:[#allocation5 + $0x9d8] ss:$28 sps:$4 sm:$0xff]   ;;  %v5579_v3 = vld [vmem:[#allocation5 + $0x9e0] ss:$28 sps:$4 sm:$0xff]  }
 0x112   :  { %2430 = vmatpush1.bf16.msra.mxu0 %v5490_v4  ;;  %2594 = vmatpush1.bf16.msra.mxu1 %v5493_v6  ;;  %v5584_v4 = vld [vmem:[#allocation5 + $0xa14] ss:$28 sps:$4 sm:$0xff]   ;;  %v5587_v6 = vld [vmem:[#allocation5 + $0xa1c] ss:$28 sps:$4 sm:$0xff]  }
 0x113   :  { %2440 = vmatprep.subr.bf16.mxu0 %v5499_v7  ;;  %2604 = vmatprep.subr.bf16.mxu1 %v5502_v8  ;;  %v5582_v7 = vld [vmem:[#allocation5 + $0xa10] ss:$28 sps:$4 sm:$0xff]   ;;  %v5585_v8 = vld [vmem:[#allocation5 + $0xa18] ss:$28 sps:$4 sm:$0xff]  }
 0x115   :  { %2432 = vmatmul.mubr.bf16.vlgmr.msra.gmra.mrb[0].mxu0 %v6449_v10  ;;  %2596 = vmatmul.mubr.bf16.vlgmr.msra.gmra.mrb[0].mxu1 %v6449_v10 }
 0x116   :  { %2441 = vmatpush1.bf16.msra.mxu0 %v5497_v9  ;;  %2605 = vmatpush1.bf16.msra.mxu1 %v5500_v11  ;;  %v5590_v9 = vld [vmem:[#allocation5 + $0xa4c] ss:$28 sps:$4 sm:$0xff]   ;;  %v5593_v11 = vld [vmem:[#allocation5 + $0xa54] ss:$28 sps:$4 sm:$0xff]  }
 0x117   :  { %2442 = vmatprep.subr.bf16.mxu0 %v5506_v12  ;;  %2606 = vmatprep.subr.bf16.mxu1 %v5509_v14  ;;  %v5588_v12 = vld [vmem:[#allocation5 + $0xa48] ss:$28 sps:$4 sm:$0xff]   ;;  %v5591_v14 = vld [vmem:[#allocation5 + $0xa50] ss:$28 sps:$4 sm:$0xff]  }
 0x118   :  { %2472 = vmatprep.mubr.bf16.mxu0 %v6455_v15  ;;  %2636 = vmatprep.mubr.bf16.mxu1 %v6455_v15 }
 0x11a   :  { %2443 = vmatpush1.bf16.msra.mxu0 %v5504_v16  ;;  %2607 = vmatpush1.bf16.msra.mxu1 %v5507_v17  ;;  %v5598_v16 = vld [vmem:[#allocation5 + $0xa84] ss:$28 sps:$4 sm:$0xff]   ;;  %v5601_v17 = vld [vmem:[#allocation5 + $0xa8c] ss:$28 sps:$4 sm:$0xff]  }
 0x11b   :  { %2444 = vmatprep.subr.bf16.mxu0 %v5512_v18  ;;  %2608 = vmatprep.subr.bf16.mxu1 %v5515_v19  ;;  %v6463_v18 = vcombine.low %v6451_v13, %v6451_v13  ;;  %v5596_v19 = vld [vmem:[#allocation5 + $0xa80] ss:$28 sps:$4 sm:$0xff]   ;;  %v5602_v13 = vld [vmem:[#allocation5 + $0x10] ss:$28 sps:$4 sm:$0xff]  }
 0x11e   :  { %2445 = vmatpush1.bf16.msra.mxu0 %v5510_v20  ;;  %2609 = vmatpush1.bf16.msra.mxu1 %v5513_v21  ;;  %v5599_v20 = vld [vmem:[#allocation5 + $0xa88] ss:$28 sps:$4 sm:$0xff]   ;;  %v5604_v21 = vld [vmem:[#allocation5 + $0x14] ss:$28 sps:$4 sm:$0xff]  }
 0x11f   :  { %2446 = vmatprep.subr.bf16.mxu0 %v5518_v22  ;;  %2610 = vmatprep.subr.bf16.mxu1 %v5521_v23  ;;  %v5642_v22 = vld [vmem:[#allocation5 + $0x1d8] ss:$28 sps:$4 sm:$0xff]   ;;  %v6281_v23 = vmov 0  }
 0x122   :  { %2447 = vmatpush1.bf16.msra.mxu0 %v5516_v24  ;;  %2611 = vmatpush1.bf16.msra.mxu1 %v5519_v25  ;;  %v6469_v24 = vld [vmem:[#allocation2 + $0x18] ss:$0 sps:$4 sm:$0xff]   ;;  %v5608_v25 = vld [vmem:[#allocation5 + $0x4c] ss:$28 sps:$4 sm:$0xff]  }
 0x123   :  { %2448 = vmatprep.subr.bf16.mxu0 %v5524_v26  ;;  %2612 = vmatprep.subr.bf16.mxu1 %v5527_v27  ;;  %v5646_v26 = vld [vmem:[#allocation5 + $0x18] ss:$28 sps:$4 sm:$0xff]   ;;  %v5647_v27 = vld [vmem:[#allocation5 + $0x210] ss:$28 sps:$4 sm:$0xff]  }
 0x126   :  { %2449 = vmatpush1.bf16.msra.mxu0 %v5522_v28  ;;  %2613 = vmatpush1.bf16.msra.mxu1 %v5525_v29  ;;  %v5606_v28 = vld [vmem:[#allocation5 + $0x48] ss:$28 sps:$4 sm:$0xff]  }
 0x127   :  { %2450 = vmatprep.subr.bf16.mxu0 %v5530_v31  ;;  %2614 = vmatprep.subr.bf16.mxu1 %v5533_v32  ;;  %v5611_v29 = vld [vmem:[#allocation5 + $0x84] ss:$28 sps:$4 sm:$0xff]   ;;  %v5651_v31 = vld [vmem:[#allocation5 + $0x50] ss:$28 sps:$4 sm:$0xff]  }
 0x128   :  { %v5652_v32 = vld [vmem:[#allocation5 + $0x248] ss:$28 sps:$4 sm:$0xff]  }
 0x12a   :  { %2451 = vmatpush1.bf16.msra.mxu0 %v5528_v33  ;;  %2615 = vmatpush1.bf16.msra.mxu1 %v5531_v34  ;;  %v5609_v33 = vld [vmem:[#allocation5 + $0x80] ss:$28 sps:$4 sm:$0xff]  }
 0x12b   :  { %2452 = vmatprep.subr.bf16.mxu0 %v5536_v35  ;;  %2616 = vmatprep.subr.bf16.mxu1 %v5539_v36  ;;  %v5614_v34 = vld [vmem:[#allocation5 + $0xbc] ss:$28 sps:$4 sm:$0xff]   ;;  %v5656_v35 = vld [vmem:[#allocation5 + $0x88] ss:$28 sps:$4 sm:$0xff]  }
 0x12c   :  { %v5657_v36 = vld [vmem:[#allocation5 + $0x280] ss:$28 sps:$4 sm:$0xff]  }
 0x12e   :  { %2453 = vmatpush1.bf16.msra.mxu0 %v5534_v37  ;;  %2617 = vmatpush1.bf16.msra.mxu1 %v5537_v38  ;;  %v5612_v37 = vld [vmem:[#allocation5 + $0xb8] ss:$28 sps:$4 sm:$0xff]  }
 0x12f   :  { %2454 = vmatprep.subr.bf16.mxu0 %v5542_v39  ;;  %2618 = vmatprep.subr.bf16.mxu1 %v5545_v40  ;;  %v5617_v38 = vld [vmem:[#allocation5 + $0xf4] ss:$28 sps:$4 sm:$0xff]   ;;  %v5661_v39 = vld [vmem:[#allocation5 + $0xc0] ss:$28 sps:$4 sm:$0xff]  }
 0x130   :  { %v5662_v40 = vld [vmem:[#allocation5 + $0x2b8] ss:$28 sps:$4 sm:$0xff]  }
 0x132   :  { %2455 = vmatpush1.bf16.msra.mxu0 %v5540_v41  ;;  %2619 = vmatpush1.bf16.msra.mxu1 %v5543_v42  ;;  %v5615_v41 = vld [vmem:[#allocation5 + $0xf0] ss:$28 sps:$4 sm:$0xff]  }
 0x133   :  { %2456 = vmatprep.subr.bf16.mxu0 %v5548_v43  ;;  %2620 = vmatprep.subr.bf16.mxu1 %v5551_v44  ;;  %v5620_v42 = vld [vmem:[#allocation5 + $0x12c] ss:$28 sps:$4 sm:$0xff]  }
 0x134   :  { %v5667_v43 = vld [vmem:[#allocation5 + $0x2f0] ss:$28 sps:$4 sm:$0xff]   ;;  %v5618_v44 = vld [vmem:[#allocation5 + $0x128] ss:$28 sps:$4 sm:$0xff]  }
 0x136   :  { %2457 = vmatpush1.bf16.msra.mxu0 %v5546_v45  ;;  %2621 = vmatpush1.bf16.msra.mxu1 %v5549_v46  ;;  %v5623_v45 = vld [vmem:[#allocation5 + $0x164] ss:$28 sps:$4 sm:$0xff]   ;;  %v5671_v46 = vld [vmem:[#allocation5 + $0x130] ss:$28 sps:$4 sm:$0xff]  }
 0x137   :  { %2458 = vmatprep.subr.bf16.mxu0 %v5554_v47  ;;  %2622 = vmatprep.subr.bf16.mxu1 %v5557_v49  ;;  %v5672_v47 = vld [vmem:[#allocation5 + $0x328] ss:$28 sps:$4 sm:$0xff]   ;;  %v5621_v49 = vld [vmem:[#allocation5 + $0x160] ss:$28 sps:$4 sm:$0xff]  }
 0x13a   :  { %2459 = vmatpush1.bf16.msra.mxu0 %v5552_v50  ;;  %2623 = vmatpush1.bf16.msra.mxu1 %v5555_v51  ;;  %v5626_v50 = vld [vmem:[#allocation5 + $0x19c] ss:$28 sps:$4 sm:$0xff]   ;;  %v5676_v51 = vld [vmem:[#allocation5 + $0x168] ss:$28 sps:$4 sm:$0xff]  }
 0x13b   :  { %2460 = vmatprep.subr.bf16.mxu0 %v5560_v52  ;;  %2624 = vmatprep.subr.bf16.mxu1 %v5563_v53  ;;  %v5677_v52 = vld [vmem:[#allocation5 + $0x360] ss:$28 sps:$4 sm:$0xff]   ;;  %v5624_v53 = vld [vmem:[#allocation5 + $0x198] ss:$28 sps:$4 sm:$0xff]  }
 0x13e   :  { %2461 = vmatpush1.bf16.msra.mxu0 %v5558_v54  ;;  %2625 = vmatpush1.bf16.msra.mxu1 %v5561_v55  ;;  %v5629_v54 = vld [vmem:[#allocation5 + $0x1d4] ss:$28 sps:$4 sm:$0xff]   ;;  %v5681_v55 = vld [vmem:[#allocation5 + $0x1a0] ss:$28 sps:$4 sm:$0xff]  }
 0x13f   :  { %2462 = vmatprep.subr.bf16.mxu0 %v5566_v56  ;;  %2626 = vmatprep.subr.bf16.mxu1 %v5569_v57  ;;  %v5682_v56 = vld [vmem:[#allocation5 + $0x558] ss:$28 sps:$4 sm:$0xff]   ;;  %v5627_v57 = vld [vmem:[#allocation5 + $0x1d0] ss:$28 sps:$4 sm:$0xff]  }
 0x142   :  { %2463 = vmatpush1.bf16.msra.mxu0 %v5564_v58  ;;  %2627 = vmatpush1.bf16.msra.mxu1 %v5567_v59  ;;  %v5632_v58 = vld [vmem:[#allocation5 + $0x20c] ss:$28 sps:$4 sm:$0xff]   ;;  %v5686_v59 = vld [vmem:[#allocation5 + $0x398] ss:$28 sps:$4 sm:$0xff]  }
 0x143   :  { %2464 = vmatprep.subr.bf16.mxu0 %v5572_v60  ;;  %2628 = vmatprep.subr.bf16.mxu1 %v5575_v61  ;;  %v5687_v60 = vld [vmem:[#allocation5 + $0x590] ss:$28 sps:$4 sm:$0xff]   ;;  %v5630_v61 = vld [vmem:[#allocation5 + $0x208] ss:$28 sps:$4 sm:$0xff]  }
 0x146   :  { %2465 = vmatpush1.bf16.msra.mxu0 %v5570_v62  ;;  %2629 = vmatpush1.bf16.msra.mxu1 %v5573_v63  ;;  %v5635_v62 = vld [vmem:[#allocation5 + $0x244] ss:$28 sps:$4 sm:$0xff]   ;;  %v5691_v63 = vld [vmem:[#allocation5 + $0x3d0] ss:$28 sps:$4 sm:$0xff]  }
 0x147   :  { %2466 = vmatprep.subr.bf16.mxu0 %v5578_v0  ;;  %2630 = vmatprep.subr.bf16.mxu1 %v5581_v1  ;;  %v5692_v0 = vld [vmem:[#allocation5 + $0x5c8] ss:$28 sps:$4 sm:$0xff]   ;;  %v5633_v1 = vld [vmem:[#allocation5 + $0x240] ss:$28 sps:$4 sm:$0xff]  }
 0x14a   :  { %2467 = vmatpush1.bf16.msra.mxu0 %v5576_v2  ;;  %2631 = vmatpush1.bf16.msra.mxu1 %v5579_v3  ;;  %v5638_v2 = vld [vmem:[#allocation5 + $0x27c] ss:$28 sps:$4 sm:$0xff]   ;;  %v5696_v3 = vld [vmem:[#allocation5 + $0x408] ss:$28 sps:$4 sm:$0xff]  }
 0x14b   :  { %2468 = vmatprep.subr.bf16.mxu0 %v5584_v4  ;;  %2632 = vmatprep.subr.bf16.mxu1 %v5587_v6  ;;  %v5697_v4 = vld [vmem:[#allocation5 + $0x600] ss:$28 sps:$4 sm:$0xff]   ;;  %v5636_v6 = vld [vmem:[#allocation5 + $0x278] ss:$28 sps:$4 sm:$0xff]  }
 0x14e   :  { %2469 = vmatpush1.bf16.msra.mxu0 %v5582_v7  ;;  %2633 = vmatpush1.bf16.msra.mxu1 %v5585_v8  ;;  %v5641_v7 = vld [vmem:[#allocation5 + $0x2b4] ss:$28 sps:$4 sm:$0xff]   ;;  %v5701_v8 = vld [vmem:[#allocation5 + $0x440] ss:$28 sps:$4 sm:$0xff]  }
 0x14f   :  { %2470 = vmatprep.subr.bf16.mxu0 %v5590_v9  ;;  %2634 = vmatprep.subr.bf16.mxu1 %v5593_v11  ;;  %v5702_v9 = vld [vmem:[#allocation5 + $0x638] ss:$28 sps:$4 sm:$0xff]   ;;  %v5639_v11 = vld [vmem:[#allocation5 + $0x2b0] ss:$28 sps:$4 sm:$0xff]  }
 0x152   :  { %2471 = vmatpush1.bf16.msra.mxu0 %v5588_v12  ;;  %2635 = vmatpush1.bf16.msra.mxu1 %v5591_v14  ;;  %v5645_v12 = vld [vmem:[#allocation5 + $0x2ec] ss:$28 sps:$4 sm:$0xff]   ;;  %v5706_v14 = vld [vmem:[#allocation5 + $0x478] ss:$28 sps:$4 sm:$0xff]  }
 0x153   :  { %2481 = vmatprep.subr.bf16.mxu0 %v5598_v16  ;;  %2645 = vmatprep.subr.bf16.mxu1 %v5601_v17  ;;  %v5707_v16 = vld [vmem:[#allocation5 + $0x670] ss:$28 sps:$4 sm:$0xff]   ;;  %v5643_v17 = vld [vmem:[#allocation5 + $0x2e8] ss:$28 sps:$4 sm:$0xff]  }
 0x155   :  { %2473 = vmatmul.mubr.bf16.vlgmr.msra.gmra.mrb[0].mxu0 %v6463_v18  ;;  %2637 = vmatmul.mubr.bf16.vlgmr.msra.gmra.mrb[0].mxu1 %v6463_v18 }
 0x156   :  { %2482 = vmatpush1.bf16.msra.mxu0 %v5596_v19  ;;  %2646 = vmatpush1.bf16.msra.mxu1 %v5599_v20  ;;  %v5650_v19 = vld [vmem:[#allocation5 + $0x324] ss:$28 sps:$4 sm:$0xff]   ;;  %v5711_v20 = vld [vmem:[#allocation5 + $0x4b0] ss:$28 sps:$4 sm:$0xff]  }
 0x157   :  { %2513 = vmatprep.mubr.bf16.mxu0 %v6281_v23  ;;  %2677 = vmatprep.mubr.bf16.mxu1 %v6281_v23 }
 0x158   :  { %2686 = vmatprep.subr.bf16.mxu0 %v5604_v21  ;;  %5103 = vmatprep.subr.bf16.mxu1 %v5642_v22  ;;  %v5712_v21 = vld [vmem:[#allocation5 + $0x6a8] ss:$28 sps:$4 sm:$0xff]   ;;  %v5648_v22 = vld [vmem:[#allocation5 + $0x320] ss:$28 sps:$4 sm:$0xff]  }
 0x161   :  { %4920 = vmatmul.mubr.msk.bf16.vlgmr.msra.gmra.mrb[0].mxu0 %vm2354_vm0, %v6469_v24  ;;  %4921 = vmatmul.mubr.msk.bf16.vlgmr.msra.gmra.mrb[0].mxu1 %vm2354_vm0, %v6469_v24 }
 0x162   :  { %2687 = vmatpush1.bf16.msra.mxu0 %v5602_v13  ;;  %5104 = vmatpush3.bf16.msra.mxu1 %v5646_v26  ;;  %v5655_v13 = vld [vmem:[#allocation5 + $0x35c] ss:$28 sps:$4 sm:$0xff]  }
 0x163   :  { %2688 = vmatprep.subr.bf16.mxu0 %v5608_v25  ;;  %5105 = vmatprep.subr.bf16.mxu1 %v5647_v27  ;;  %v5716_v25 = vld [vmem:[#allocation5 + $0x4e8] ss:$28 sps:$4 sm:$0xff]   ;;  %v5717_v26 = vld [vmem:[#allocation5 + $0x6e0] ss:$28 sps:$4 sm:$0xff]   ;;  %v5653_v27 = vld [vmem:[#allocation5 + $0x358] ss:$28 sps:$4 sm:$0xff]  }
 0x164   :  { %2718 = vmatprep.mubr.bf16.mxu0 %v6431_v48  ;;  %2882 = vmatprep.mubr.bf16.mxu1 %v6431_v48  ;;  %v5666_v48 = vld [vmem:[#allocation5 + $0xf8] ss:$28 sps:$4 sm:$0xff]  }
 0x166   :  { %2689 = vmatpush1.bf16.msra.mxu0 %v5606_v28  ;;  %5106 = vmatpush3.bf16.msra.mxu1 %v5651_v31  ;;  %v5660_v28 = vld [vmem:[#allocation5 + $0x394] ss:$28 sps:$4 sm:$0xff]  }
 0x167   :  { %2690 = vmatprep.subr.bf16.mxu0 %v5611_v29  ;;  %5107 = vmatprep.subr.bf16.mxu1 %v5652_v32  ;;  %v5721_v29 = vld [vmem:[#allocation5 + $0x520] ss:$28 sps:$4 sm:$0xff]   ;;  %v5722_v31 = vld [vmem:[#allocation5 + $0x8d8] ss:$28 sps:$4 sm:$0xff]   ;;  %v5658_v32 = vld [vmem:[#allocation5 + $0x390] ss:$28 sps:$4 sm:$0xff]  }
 0x16a   :  { %2691 = vmatpush1.bf16.msra.mxu0 %v5609_v33  ;;  %5108 = vmatpush3.bf16.msra.mxu1 %v5656_v35  ;;  %v5726_v33 = vld [vmem:[#allocation5 + $0x718] ss:$28 sps:$4 sm:$0xff]   ;;  %v5727_v35 = vld [vmem:[#allocation5 + $0x910] ss:$28 sps:$4 sm:$0xff]  }
 0x16b   :  { %2692 = vmatprep.subr.bf16.mxu0 %v5614_v34  ;;  %5109 = vmatprep.subr.bf16.mxu1 %v5657_v36  ;;  %v5665_v34 = vld [vmem:[#allocation5 + $0x3cc] ss:$28 sps:$4 sm:$0xff]  }
 0x16c   :  { %v5663_v36 = vld [vmem:[#allocation5 + $0x3c8] ss:$28 sps:$4 sm:$0xff]  }
 0x16e   :  { %2693 = vmatpush1.bf16.msra.mxu0 %v5612_v37  ;;  %5110 = vmatpush3.bf16.msra.mxu1 %v5661_v39  ;;  %v5670_v37 = vld [vmem:[#allocation5 + $0x404] ss:$28 sps:$4 sm:$0xff]  }
 0x16f   :  { %2694 = vmatprep.subr.bf16.mxu0 %v5617_v38  ;;  %5111 = vmatprep.subr.bf16.mxu1 %v5662_v40  ;;  %v5731_v38 = vld [vmem:[#allocation5 + $0x750] ss:$28 sps:$4 sm:$0xff]   ;;  %v5732_v39 = vld [vmem:[#allocation5 + $0x948] ss:$28 sps:$4 sm:$0xff]   ;;  %v5668_v40 = vld [vmem:[#allocation5 + $0x400] ss:$28 sps:$4 sm:$0xff]  }
 0x172   :  { %2695 = vmatpush1.bf16.msra.mxu0 %v5615_v41  ;;  %5112 = vmatpush3.bf16.msra.mxu1 %v5666_v48  ;;  %v5736_v41 = vld [vmem:[#allocation5 + $0x788] ss:$28 sps:$4 sm:$0xff]   ;;  %v5675_v48 = vld [vmem:[#allocation5 + $0x43c] ss:$28 sps:$4 sm:$0xff]  }
 0x173   :  { %2696 = vmatprep.subr.bf16.mxu0 %v5620_v42  ;;  %5113 = vmatprep.subr.bf16.mxu1 %v5667_v43  ;;  %v5737_v42 = vld [vmem:[#allocation5 + $0x980] ss:$28 sps:$4 sm:$0xff]  }
 0x174   :  { %v5741_v43 = vld [vmem:[#allocation5 + $0x7c0] ss:$28 sps:$4 sm:$0xff]  }
 0x176   :  { %2697 = vmatpush1.bf16.msra.mxu0 %v5618_v44  ;;  %5114 = vmatpush3.bf16.msra.mxu1 %v5671_v46  ;;  %v5680_v44 = vld [vmem:[#allocation5 + $0x474] ss:$28 sps:$4 sm:$0xff]  }
 0x177   :  { %2698 = vmatprep.subr.bf16.mxu0 %v5623_v45  ;;  %5115 = vmatprep.subr.bf16.mxu1 %v5672_v47  ;;  %v5742_v45 = vld [vmem:[#allocation5 + $0x9b8] ss:$28 sps:$4 sm:$0xff]   ;;  %v5678_v46 = vld [vmem:[#allocation5 + $0x470] ss:$28 sps:$4 sm:$0xff]  }
 0x178   :  { %v5685_v47 = vld [vmem:[#allocation5 + $0x4ac] ss:$28 sps:$4 sm:$0xff]  }
 0x17a   :  { %2699 = vmatpush1.bf16.msra.mxu0 %v5621_v49  ;;  %5116 = vmatpush3.bf16.msra.mxu1 %v5676_v51  ;;  %v5746_v49 = vld [vmem:[#allocation5 + $0x7f8] ss:$28 sps:$4 sm:$0xff]   ;;  %v5751_v51 = vld [vmem:[#allocation5 + $0x830] ss:$28 sps:$4 sm:$0xff]  }
 0x17b   :  { %2700 = vmatprep.subr.bf16.mxu0 %v5626_v50  ;;  %5117 = vmatprep.subr.bf16.mxu1 %v5677_v52  ;;  %v5683_v50 = vld [vmem:[#allocation5 + $0x4a8] ss:$28 sps:$4 sm:$0xff]  }
 0x17c   :  { %v5690_v52 = vld [vmem:[#allocation5 + $0x4e4] ss:$28 sps:$4 sm:$0xff]  }
 0x17e   :  { %2701 = vmatpush1.bf16.msra.mxu0 %v5624_v53  ;;  %5118 = vmatpush3.bf16.msra.mxu1 %v5681_v55  ;;  %v5752_v53 = vld [vmem:[#allocation5 + $0xa28] ss:$28 sps:$4 sm:$0xff]   ;;  %v5695_v55 = vld [vmem:[#allocation5 + $0x51c] ss:$28 sps:$4 sm:$0xff]  }
 0x17f   :  { %2702 = vmatprep.subr.bf16.mxu0 %v5629_v54  ;;  %5125 = vmatprep.subr.bf16.mxu1 %v5682_v56  ;;  %v5688_v54 = vld [vmem:[#allocation5 + $0x4e0] ss:$28 sps:$4 sm:$0xff]   ;;  %v5756_v56 = vld [vmem:[#allocation5 + $0x868] ss:$28 sps:$4 sm:$0xff]  }
 0x181   :  { %2883 = vmatmul.mubr.bf16.vlgmr.msra.gmra.mrb[4].mxu1 %v6435_v5 }
 0x182   :  { %2703 = vmatpush1.bf16.msra.mxu0 %v5627_v57  ;;  %5126 = vmatpush3.bf16.msra.mxu1 %v5686_v59  ;;  %v5757_v57 = vld [vmem:[#allocation5 + $0xa60] ss:$28 sps:$4 sm:$0xff]   ;;  %v5700_v59 = vld [vmem:[#allocation5 + $0x554] ss:$28 sps:$4 sm:$0xff]  }
 0x183   :  { %2704 = vmatprep.subr.bf16.mxu0 %v5632_v58  ;;  %5127 = vmatprep.subr.bf16.mxu1 %v5687_v60  ;;  %v5693_v58 = vld [vmem:[#allocation5 + $0x518] ss:$28 sps:$4 sm:$0xff]   ;;  %v5761_v60 = vld [vmem:[#allocation5 + $0x8a0] ss:$28 sps:$4 sm:$0xff]  }
 0x184   :  { %2922 = vmatprep.mubr.bf16.mxu1 %v6443_v30 }
 0x186   :  { %2705 = vmatpush1.bf16.msra.mxu0 %v5630_v61  ;;  %5128 = vmatpush3.bf16.msra.mxu1 %v5691_v63  ;;  %v5698_v61 = vld [vmem:[#allocation5 + $0x550] ss:$28 sps:$4 sm:$0xff]   ;;  %v5768_v63 = vld [vmem:[#allocation5 + $0xa98] ss:$28 sps:$4 sm:$0xff]  }
 0x187   :  { %2706 = vmatprep.subr.bf16.mxu0 %v5635_v62  ;;  %5129 = vmatprep.subr.bf16.mxu1 %v5692_v0  ;;  %v5705_v62 = vld [vmem:[#allocation5 + $0x58c] ss:$28 sps:$4 sm:$0xff]  }
 0x188   :  { %v5780_v0 = vld [vmem:[#allocation8 + $0x4] ss:$8 sps:$4 sm:$0xff]  }
 0x18a   :  { %2707 = vmatpush1.bf16.msra.mxu0 %v5633_v1  ;;  %5130 = vmatpush3.bf16.msra.mxu1 %v5696_v3  ;;  %v6282_v1 = vmov 0.0   ;;  %v5710_v3 = vld [vmem:[#allocation5 + $0x5c4] ss:$28 sps:$4 sm:$0xff]  }
 0x18b   :  { %2708 = vmatprep.subr.bf16.mxu0 %v5638_v2  ;;  %5131 = vmatprep.subr.bf16.mxu1 %v5697_v4  ;;  %v5703_v2 = vld [vmem:[#allocation5 + $0x588] ss:$28 sps:$4 sm:$0xff]   ;;  %v5708_v4 = vld [vmem:[#allocation5 + $0x5c0] ss:$28 sps:$4 sm:$0xff]  }
 0x18e   :  { %2709 = vmatpush1.bf16.msra.mxu0 %v5636_v6  ;;  %5132 = vmatpush3.bf16.msra.mxu1 %v5701_v8  ;;  %v5715_v6 = vld [vmem:[#allocation5 + $0x5fc] ss:$28 sps:$4 sm:$0xff]  }
 0x18f   :  { %2710 = vmatprep.subr.bf16.mxu0 %v5641_v7  ;;  %5133 = vmatprep.subr.bf16.mxu1 %v5702_v9  ;;  %v5778_v7 = vld [vmem:[#allocation8] ss:$8 sps:$4 sm:$0xff]   ;;  %v5786_v8 = vld [vmem:[#allocation8 + $0x14] ss:$8 sps:$4 sm:$0xff]  }
 0x190   :  { %v5713_v9 = vld [vmem:[#allocation5 + $0x5f8] ss:$28 sps:$4 sm:$0xff]  }
 0x192   :  { %2711 = vmatpush1.bf16.msra.mxu0 %v5639_v11  ;;  %5134 = vmatpush3.bf16.msra.mxu1 %v5706_v14  ;;  %v5784_v11 = vld [vmem:[#allocation8 + $0x10] ss:$8 sps:$4 sm:$0xff]   ;;  %v5792_v14 = vld [vmem:[#allocation8 + $0x24] ss:$8 sps:$4 sm:$0xff]  }
 0x193   :  { %2712 = vmatprep.subr.bf16.mxu0 %v5645_v12  ;;  %5135 = vmatprep.subr.bf16.mxu1 %v5707_v16  ;;  %v5720_v12 = vld [vmem:[#allocation5 + $0x634] ss:$28 sps:$4 sm:$0xff]  }
 0x194   :  { %v5718_v16 = vld [vmem:[#allocation5 + $0x630] ss:$28 sps:$4 sm:$0xff]  }
 0x196   :  { %2713 = vmatpush1.bf16.msra.mxu0 %v5643_v17  ;;  %5136 = vmatpush3.bf16.msra.mxu1 %v5711_v20  ;;  %v5790_v17 = vld [vmem:[#allocation8 + $0x20] ss:$8 sps:$4 sm:$0xff]   ;;  %v5798_v20 = vld [vmem:[#allocation8 + $0x34] ss:$8 sps:$4 sm:$0xff]  }
 0x197   :  { %2714 = vmatprep.subr.bf16.mxu0 %v5650_v19  ;;  %5137 = vmatprep.subr.bf16.mxu1 %v5712_v21  ;;  %v5725_v19 = vld [vmem:[#allocation5 + $0x66c] ss:$28 sps:$4 sm:$0xff]  }
 0x198   :  { %v5723_v21 = vld [vmem:[#allocation5 + $0x668] ss:$28 sps:$4 sm:$0xff]  }
 0x19a   :  { %2715 = vmatpush1.bf16.msra.mxu0 %v5648_v22  ;;  %5138 = vmatpush3.bf16.msra.mxu1 %v5716_v25  ;;  %v5796_v22 = vld [vmem:[#allocation8 + $0x30] ss:$8 sps:$4 sm:$0xff]   ;;  %v5804_v25 = vld [vmem:[#allocation8 + $0x44] ss:$8 sps:$4 sm:$0xff]  }
 0x19b   :  { %2716 = vmatprep.subr.bf16.mxu0 %v5655_v13  ;;  %5139 = vmatprep.subr.bf16.mxu1 %v5717_v26  ;;  %v5730_v13 = vld [vmem:[#allocation5 + $0x6a4] ss:$28 sps:$4 sm:$0xff]  }
 0x19c   :  { %v5802_v26 = vld [vmem:[#allocation8 + $0x40] ss:$8 sps:$4 sm:$0xff]  }
 0x19e   :  { %2717 = vmatpush1.bf16.msra.mxu0 %v5653_v27  ;;  %5140 = vmatpush3.bf16.msra.mxu1 %v5721_v29  ;;  %v5735_v27 = vld [vmem:[#allocation5 + $0x6dc] ss:$28 sps:$4 sm:$0xff]  }
 0x19f   :  { %2727 = vmatprep.subr.bf16.mxu0 %v5660_v28  ;;  %5147 = vmatprep.subr.bf16.mxu1 %v5722_v31  ;;  %v5810_v28 = vld [vmem:[#allocation8 + $0x54] ss:$8 sps:$4 sm:$0xff]   ;;  %v5808_v31 = vld [vmem:[#allocation8 + $0x50] ss:$8 sps:$4 sm:$0xff]  }
 0x1a0   :  { %v5733_v29 = vld [vmem:[#allocation5 + $0x6d8] ss:$28 sps:$4 sm:$0xff]  }
 0x1a1   :  { %2719 = vmatmul.mubr.bf16.vlgmr.msra.gmra.mrb[4].mxu0 %v6435_v5  ;;  %2923 = vmatmul.mubr.bf16.vlgmr.msra.gmra.mrb[8].mxu1 %v6449_v10  ;;  %v5673_v5 = vld [vmem:[#allocation5 + $0x438] ss:$28 sps:$4 sm:$0xff]  }
 0x1a2   :  { %2728 = vmatpush1.bf16.msra.mxu0 %v5658_v32  ;;  %5148 = vmatpush3.bf16.msra.mxu1 %v5726_v33  ;;  %v5740_v32 = vld [vmem:[#allocation5 + $0x714] ss:$28 sps:$4 sm:$0xff]   ;;  %v5816_v33 = vld [vmem:[#allocation8 + $0x64] ss:$8 sps:$4 sm:$0xff]  }
 0x1a3   :  { %2729 = vmatprep.subr.bf16.mxu0 %v5665_v34  ;;  %5149 = vmatprep.subr.bf16.mxu1 %v5727_v35  ;;  %v5738_v34 = vld [vmem:[#allocation5 + $0x710] ss:$28 sps:$4 sm:$0xff]   ;;  %v5814_v35 = vld [vmem:[#allocation8 + $0x60] ss:$8 sps:$4 sm:$0xff]  }
 0x1a4   :  { %2759 = vmatprep.mubr.bf16.mxu0 %v6443_v30  ;;  %2962 = vmatprep.mubr.bf16.mxu1 %v6455_v15  ;;  %v5747_v30 = vld [vmem:[#allocation5 + $0x9f0] ss:$28 sps:$4 sm:$0xff]  }
 0x1a6   :  { %2730 = vmatpush1.bf16.msra.mxu0 %v5663_v36  ;;  %5150 = vmatpush3.bf16.msra.mxu1 %v5731_v38  ;;  %v5745_v36 = vld [vmem:[#allocation5 + $0x74c] ss:$28 sps:$4 sm:$0xff]  }
 0x1a7   :  { %2731 = vmatprep.subr.bf16.mxu0 %v5670_v37  ;;  %5151 = vmatprep.subr.bf16.mxu1 %v5732_v39  ;;  %v5822_v37 = vld [vmem:[#allocation8 + $0x74] ss:$8 sps:$4 sm:$0xff]   ;;  %v5743_v38 = vld [vmem:[#allocation5 + $0x748] ss:$28 sps:$4 sm:$0xff]   ;;  %v5820_v39 = vld [vmem:[#allocation8 + $0x70] ss:$8 sps:$4 sm:$0xff]  }
 0x1aa   :  { %2732 = vmatpush1.bf16.msra.mxu0 %v5668_v40  ;;  %5152 = vmatpush3.bf16.msra.mxu1 %v5736_v41  ;;  %v5750_v40 = vld [vmem:[#allocation5 + $0x784] ss:$28 sps:$4 sm:$0xff]  }
 0x1ab   :  { %2733 = vmatprep.subr.bf16.mxu0 %v5675_v48  ;;  %5153 = vmatprep.subr.bf16.mxu1 %v5737_v42  ;;  %v5825_v41 = vld [vmem:[#allocation8 + $0x84] ss:$8 sps:$4 sm:$0xff]   ;;  %v5748_v48 = vld [vmem:[#allocation5 + $0x780] ss:$28 sps:$4 sm:$0xff]  }
 0x1ac   :  { %v5823_v42 = vld [vmem:[#allocation8 + $0x80] ss:$8 sps:$4 sm:$0xff]  }
 0x1ae   :  { %2734 = vmatpush1.bf16.msra.mxu0 %v5673_v5  ;;  %5154 = vmatpush3.bf16.msra.mxu1 %v5741_v43  ;;  %v5755_v5 = vld [vmem:[#allocation5 + $0x7bc] ss:$28 sps:$4 sm:$0xff]  }
 0x1af   :  { %2735 = vmatprep.subr.bf16.mxu0 %v5680_v44  ;;  %5155 = vmatprep.subr.bf16.mxu1 %v5742_v45  ;;  %v5828_v43 = vld [vmem:[#allocation8 + $0x94] ss:$8 sps:$4 sm:$0xff]   ;;  %v5826_v44 = vld [vmem:[#allocation8 + $0x90] ss:$8 sps:$4 sm:$0xff]  }
 0x1b0   :  { %v5760_v45 = vld [vmem:[#allocation5 + $0x7f4] ss:$28 sps:$4 sm:$0xff]  }
 0x1b2   :  { %2736 = vmatpush1.bf16.msra.mxu0 %v5678_v46  ;;  %5156 = vmatpush3.bf16.msra.mxu1 %v5746_v49  ;;  %v5831_v46 = vld [vmem:[#allocation8 + $0xa4] ss:$8 sps:$4 sm:$0xff]  }
 0x1b3   :  { %2737 = vmatprep.subr.bf16.mxu0 %v5685_v47  ;;  %5157 = vmatprep.subr.bf16.mxu1 %v5747_v30  ;;  %v5829_v47 = vld [vmem:[#allocation8 + $0xa0] ss:$8 sps:$4 sm:$0xff]   ;;  %v5834_v30 = vld [vmem:[#allocation8 + $0xb4] ss:$8 sps:$4 sm:$0xff]  }
 0x1b4   :  { %v5764_v49 = vld [vmem:[#allocation5 + $0x82c] ss:$28 sps:$4 sm:$0xff]  }
 0x1b6   :  { %2738 = vmatpush1.bf16.msra.mxu0 %v5683_v50  ;;  %5158 = vmatpush3.bf16.msra.mxu1 %v5751_v51  ;;  %v5762_v50 = vld [vmem:[#allocation5 + $0x828] ss:$28 sps:$4 sm:$0xff]   ;;  %v5832_v51 = vld [vmem:[#allocation8 + $0xb0] ss:$8 sps:$4 sm:$0xff]  }
 0x1b7   :  { %2739 = vmatprep.subr.bf16.mxu0 %v5690_v52  ;;  %5159 = vmatprep.subr.bf16.mxu1 %v5752_v53  ;;  %v5767_v52 = vld [vmem:[#allocation5 + $0x864] ss:$28 sps:$4 sm:$0xff]  }
 0x1b8   :  { %v5837_v53 = vld [vmem:[#allocation8 + $0xc4] ss:$8 sps:$4 sm:$0xff]  }
 0x1ba   :  { %2740 = vmatpush1.bf16.msra.mxu0 %v5688_v54  ;;  %5160 = vmatpush3.bf16.msra.mxu1 %v5756_v56  ;;  %v5765_v54 = vld [vmem:[#allocation5 + $0x860] ss:$28 sps:$4 sm:$0xff]  }
 0x1bb   :  { %2741 = vmatprep.subr.bf16.mxu0 %v5695_v55  ;;  %5161 = vmatprep.subr.bf16.mxu1 %v5757_v57  ;;  %v5835_v55 = vld [vmem:[#allocation8 + $0xc0] ss:$8 sps:$4 sm:$0xff]   ;;  %v5771_v56 = vld [vmem:[#allocation5 + $0x89c] ss:$28 sps:$4 sm:$0xff]  }
 0x1bc   :  { %v5840_v57 = vld [vmem:[#allocation8 + $0xd4] ss:$8 sps:$4 sm:$0xff]  }
 0x1be   :  { %2742 = vmatpush1.bf16.msra.mxu0 %v5693_v58  ;;  %5162 = vmatpush3.bf16.msra.mxu1 %v5761_v60  ;;  %v5769_v58 = vld [vmem:[#allocation5 + $0x898] ss:$28 sps:$4 sm:$0xff]  }
 0x1bf   :  { %2743 = vmatprep.subr.bf16.mxu0 %v5700_v59  ;;  %5202 = vmatprep.subr.bf16.mxu1 %v6282_v1  ;;  %v5838_v59 = vld [vmem:[#allocation8 + $0xd0] ss:$8 sps:$4 sm:$0xff]  }
 0x1c0   :  { %v5774_v60 = vld [vmem:[#allocation5 + $0x8d4] ss:$28 sps:$4 sm:$0xff]  }
 0x1c1   :  { %2963 = vmatmul.mubr.bf16.vlgmr.msra.gmra.mrb[12].mxu1 %v6463_v18 }
 0x1c2   :  { %2744 = vmatpush1.bf16.msra.mxu0 %v5698_v61  ;;  %5203 = vmatpush3.bf16.msra.mxu1 %v5768_v63  ;;  %v5843_v61 = vld [vmem:[#allocation8 + $0xe4] ss:$8 sps:$4 sm:$0xff]   ;;  %v5841_v63 = vld [vmem:[#allocation8 + $0xe0] ss:$8 sps:$4 sm:$0xff]  }
 0x1c3   :  { %2745 = vmatprep.subr.bf16.mxu0 %v5705_v62  ;;  %5204 = vmatprep.mubr.msk.bf16.mxu1 %vm6283_vm1, %v6282_v1  ;;  %v5772_v62 = vld [vmem:[#allocation5 + $0x8d0] ss:$28 sps:$4 sm:$0xff]  }
 0x1c4   :  { %3627 = vmatprep.subr.bf16.mxu1 %v5780_v0  ;;  %v5777_v0 = vld [vmem:[#allocation5 + $0x90c] ss:$28 sps:$4 sm:$0xff]  }
 0x1c6   :  { %2746 = vmatpush1.bf16.msra.mxu0 %v5703_v2  ;;  %v5846_v2 = vld [vmem:[#allocation8 + $0xf4] ss:$8 sps:$4 sm:$0xff]  }
 0x1c7   :  { %2747 = vmatprep.subr.bf16.mxu0 %v5710_v3  ;;  %v5775_v3 = vld [vmem:[#allocation5 + $0x908] ss:$28 sps:$4 sm:$0xff]  }
 0x1c9   :  { %5205 = vmatmul.mubr.msk.bf16.vlgmr.msra.gmra.mrb[16].mxu1 %vm2354_vm0, %v6469_v24  ;;  %v5728_v24 = vld [vmem:[#allocation5 + $0x6a0] ss:$28 sps:$4 sm:$0xff]  }
 0x1ca   :  { %2748 = vmatpush1.bf16.msra.mxu0 %v5708_v4  ;;  %3628 = vmatpush1.bf16.msra.mxu1 %v5778_v7  ;;  %v5844_v4 = vld [vmem:[#allocation8 + $0xf0] ss:$8 sps:$4 sm:$0xff]   ;;  %v5849_v7 = vld [vmem:[#allocation8 + $0x104] ss:$8 sps:$4 sm:$0xff]  }
 0x1cb   :  { %2749 = vmatprep.subr.bf16.mxu0 %v5715_v6  ;;  %3629 = vmatprep.subr.bf16.mxu1 %v5786_v8  ;;  %v5783_v6 = vld [vmem:[#allocation5 + $0x944] ss:$28 sps:$4 sm:$0xff]  }
 0x1cc   :  { %v5781_v8 = vld [vmem:[#allocation5 + $0x940] ss:$28 sps:$4 sm:$0xff]  }
 0x1ce   :  { %2750 = vmatpush1.bf16.msra.mxu0 %v5713_v9  ;;  %3630 = vmatpush1.bf16.msra.mxu1 %v5784_v11  ;;  %v5789_v9 = vld [vmem:[#allocation5 + $0x97c] ss:$28 sps:$4 sm:$0xff]  }
 0x1cf   :  { %2751 = vmatprep.subr.bf16.mxu0 %v5720_v12  ;;  %3631 = vmatprep.subr.bf16.mxu1 %v5792_v14  ;;  %v5787_v11 = vld [vmem:[#allocation5 + $0x978] ss:$28 sps:$4 sm:$0xff]   ;;  %v5793_v14 = vld [vmem:[#allocation5 + $0x9b0] ss:$28 sps:$4 sm:$0xff]  }
 0x1d0   :  { %v5795_v12 = vld [vmem:[#allocation5 + $0x9b4] ss:$28 sps:$4 sm:$0xff]  }
 0x1d2   :  { %2752 = vmatpush1.bf16.msra.mxu0 %v5718_v16  ;;  %3632 = vmatpush1.bf16.msra.mxu1 %v5790_v17  ;;  %v5801_v16 = vld [vmem:[#allocation5 + $0x9ec] ss:$28 sps:$4 sm:$0xff]  }
 0x1d3   :  { %2753 = vmatprep.subr.bf16.mxu0 %v5725_v19  ;;  %3633 = vmatprep.subr.bf16.mxu1 %v5798_v20  ;;  %v5799_v17 = vld [vmem:[#allocation5 + $0x9e8] ss:$28 sps:$4 sm:$0xff]   ;;  %v5805_v20 = vld [vmem:[#allocation5 + $0xa20] ss:$28 sps:$4 sm:$0xff]  }
 0x1d4   :  { %v5807_v19 = vld [vmem:[#allocation5 + $0xa24] ss:$28 sps:$4 sm:$0xff]  }
 0x1d6   :  { %2754 = vmatpush1.bf16.msra.mxu0 %v5723_v21  ;;  %3634 = vmatpush1.bf16.msra.mxu1 %v5796_v22  ;;  %v5813_v21 = vld [vmem:[#allocation5 + $0xa5c] ss:$28 sps:$4 sm:$0xff]  }
 0x1d7   :  { %2755 = vmatprep.subr.bf16.mxu0 %v5730_v13  ;;  %3635 = vmatprep.subr.bf16.mxu1 %v5804_v25  ;;  %v5811_v22 = vld [vmem:[#allocation5 + $0xa58] ss:$28 sps:$4 sm:$0xff]   ;;  %v5817_v25 = vld [vmem:[#allocation5 + $0xa90] ss:$28 sps:$4 sm:$0xff]  }
 0x1d8   :  { %v5819_v13 = vld [vmem:[#allocation5 + $0xa94] ss:$28 sps:$4 sm:$0xff]  }
 0x1da   :  { %2756 = vmatpush1.bf16.msra.mxu0 %v5728_v24  ;;  %3636 = vmatpush1.bf16.msra.mxu1 %v5802_v26  ;;  %v531_v24 = vlaneseq }
 0x1db   :  { %2757 = vmatprep.subr.bf16.mxu0 %v5735_v27  ;;  %3637 = vmatprep.subr.bf16.mxu1 %v5810_v28  ;;  %v6056_v27 = vld [vmem:[#allocation2 + $0x18] ss:$0 sps:$4 sm:$0xff]  }
 0x1dc   :  { %v6493_v26 = vshrl.u32 %v531_v24, 7 }
 0x1de   :  { %2758 = vmatpush1.bf16.msra.mxu0 %v5733_v29  ;;  %3638 = vmatpush1.bf16.msra.mxu1 %v5808_v31  ;;  %v6497_v28 = vsub.s32 0, %v6493_v26  ;;  %v6499_v29 = vld [vmem:[#allocation7] sm:$0x7f]  ;;  %v6502_v31 = vsub.s32 1, %v6493_v26 }
 0x1df   :  { %2768 = vmatprep.subr.bf16.mxu0 %v5740_v32  ;;  %3639 = vmatprep.subr.bf16.mxu1 %v5816_v33  ;;  %v545_v32 = vsub.s32 3, %v6493_v26 }
 0x1e0   :  { %v538_v33 = vrot.slane %v6499_v29, %v6502_v31 }
 0x1e1   :  { %2760 = vmatmul.mubr.bf16.vlgmr.msra.gmra.mrb[4].mxu0 %v6449_v10  ;;  %v5753_v10 = vld [vmem:[#allocation5 + $0x7b8] ss:$28 sps:$4 sm:$0xff]  }
 0x1e2   :  { %2769 = vmatpush1.bf16.msra.mxu0 %v5738_v34  ;;  %3640 = vmatpush1.bf16.msra.mxu1 %v5814_v35  ;;  %v546_v34 = vrot.slane %v6499_v29, %v545_v32 }
 0x1e3   :  { %2770 = vmatprep.subr.bf16.mxu0 %v5745_v36  ;;  %2800 = vmatprep.mubr.bf16.mxu0 %v6455_v15  ;;  %v5758_v15 = vld [vmem:[#allocation5 + $0x7f0] ss:$28 sps:$4 sm:$0xff]  }
 0x1e4   :  { %3641 = vmatprep.subr.bf16.mxu1 %v5822_v37 }
 0x1e6   :  { %2771 = vmatpush1.bf16.msra.mxu0 %v5743_v38  ;;  %3642 = vmatpush1.bf16.msra.mxu1 %v5820_v39 }
 0x1e7   :  { %2772 = vmatprep.subr.bf16.mxu0 %v5750_v40  ;;  %3643 = vmatprep.subr.bf16.mxu1 %v5825_v41 }
 0x1ea   :  { %2773 = vmatpush1.bf16.msra.mxu0 %v5748_v48  ;;  %3644 = vmatpush1.bf16.msra.mxu1 %v5823_v42 }
 0x1eb   :  { %2774 = vmatprep.subr.bf16.mxu0 %v5755_v5  ;;  %3645 = vmatprep.subr.bf16.mxu1 %v5828_v43 }
 0x1ee   :  { %2775 = vmatpush1.bf16.msra.mxu0 %v5753_v10  ;;  %3646 = vmatpush1.bf16.msra.mxu1 %v5826_v44 }
 0x1ef   :  { %2776 = vmatprep.subr.bf16.mxu0 %v5760_v45  ;;  %3647 = vmatprep.subr.bf16.mxu1 %v5831_v46 }
 0x1f2   :  { %2777 = vmatpush1.bf16.msra.mxu0 %v5758_v15  ;;  %3648 = vmatpush1.bf16.msra.mxu1 %v5829_v47  ;;  %v5847_v15 = vld [vmem:[#allocation8 + $0x100] ss:$8 sps:$4 sm:$0xff]  }
 0x1f3   :  { %2778 = vmatprep.subr.bf16.mxu0 %v5764_v49  ;;  %3649 = vmatprep.subr.bf16.mxu1 %v5834_v30  ;;  %v5852_v49 = vld [vmem:[#allocation8 + $0x114] ss:$8 sps:$4 sm:$0xff]  }
 0x1f6   :  { %2779 = vmatpush1.bf16.msra.mxu0 %v5762_v50  ;;  %3650 = vmatpush1.bf16.msra.mxu1 %v5832_v51  ;;  %v5850_v50 = vld [vmem:[#allocation8 + $0x110] ss:$8 sps:$4 sm:$0xff]   ;;  %v5855_v51 = vld [vmem:[#allocation8 + $0x124] ss:$8 sps:$4 sm:$0xff]  }
 0x1f7   :  { %2780 = vmatprep.subr.bf16.mxu0 %v5767_v52  ;;  %3651 = vmatprep.subr.bf16.mxu1 %v5837_v53  ;;  %v5853_v52 = vld [vmem:[#allocation8 + $0x120] ss:$8 sps:$4 sm:$0xff]   ;;  %v5858_v53 = vld [vmem:[#allocation8 + $0x134] ss:$8 sps:$4 sm:$0xff]  }
 0x1fa   :  { %2781 = vmatpush1.bf16.msra.mxu0 %v5765_v54  ;;  %3652 = vmatpush1.bf16.msra.mxu1 %v5835_v55  ;;  %v5856_v54 = vld [vmem:[#allocation8 + $0x130] ss:$8 sps:$4 sm:$0xff]   ;;  %v5861_v55 = vld [vmem:[#allocation8 + $0x144] ss:$8 sps:$4 sm:$0xff]  }
 0x1fb   :  { %2782 = vmatprep.subr.bf16.mxu0 %v5771_v56  ;;  %3653 = vmatprep.subr.bf16.mxu1 %v5840_v57  ;;  %v5859_v56 = vld [vmem:[#allocation8 + $0x140] ss:$8 sps:$4 sm:$0xff]  }
 0x1fe   :  { %2783 = vmatpush1.bf16.msra.mxu0 %v5769_v58  ;;  %3654 = vmatpush1.bf16.msra.mxu1 %v5838_v59  ;;  %v5864_v58 = vld [vmem:[#allocation8 + $0x154] ss:$8 sps:$4 sm:$0xff]  }
 0x1ff   :  { %2784 = vmatprep.subr.bf16.mxu0 %v5774_v60  ;;  %3655 = vmatprep.subr.bf16.mxu1 %v5843_v61 }
 0x202   :  { %2785 = vmatpush1.bf16.msra.mxu0 %v5772_v62  ;;  %3656 = vmatpush1.bf16.msra.mxu1 %v5841_v63  ;;  %v5862_v63 = vld [vmem:[#allocation8 + $0x150] ss:$8 sps:$4 sm:$0xff]  }
 0x203   :  { %2786 = vmatprep.subr.bf16.mxu0 %v5777_v0  ;;  %3657 = vmatprep.subr.bf16.mxu1 %v5846_v2  ;;  %v5867_v0 = vld [vmem:[#allocation8 + $0x164] ss:$8 sps:$4 sm:$0xff]   ;;  %v5865_v2 = vld [vmem:[#allocation8 + $0x160] ss:$8 sps:$4 sm:$0xff]  }
 0x206   :  { %2787 = vmatpush1.bf16.msra.mxu0 %v5775_v3  ;;  %3658 = vmatpush1.bf16.msra.mxu1 %v5844_v4  ;;  %v5870_v3 = vld [vmem:[#allocation8 + $0x174] ss:$8 sps:$4 sm:$0xff]   ;;  %v5868_v4 = vld [vmem:[#allocation8 + $0x170] ss:$8 sps:$4 sm:$0xff]  }
 0x207   :  { %2788 = vmatprep.subr.bf16.mxu0 %v5783_v6  ;;  %3668 = vmatprep.subr.bf16.mxu1 %v5849_v7  ;;  %v5873_v6 = vld [vmem:[#allocation8 + $0x184] ss:$8 sps:$4 sm:$0xff]   ;;  %v5871_v7 = vld [vmem:[#allocation8 + $0x180] ss:$8 sps:$4 sm:$0xff]  }
 0x20a   :  { %2789 = vmatpush1.bf16.msra.mxu0 %v5781_v8  ;;  %v5876_v8 = vld [vmem:[#allocation8 + $0x194] ss:$8 sps:$4 sm:$0xff]  }
 0x20b   :  { %2790 = vmatprep.subr.bf16.mxu0 %v5789_v9  ;;  %v5874_v9 = vld [vmem:[#allocation8 + $0x190] ss:$8 sps:$4 sm:$0xff]  }
 0x20e   :  { %2791 = vmatpush1.bf16.msra.mxu0 %v5787_v11  ;;  %v5879_v11 = vld [vmem:[#allocation8 + $0x1a4] ss:$8 sps:$4 sm:$0xff]  }
 0x20f   :  { %2792 = vmatprep.subr.bf16.mxu0 %v5795_v12  ;;  %v541_v12 = vsub.s32 2, %v6493_v26 }
 0x212   :  { %2793 = vmatpush1.bf16.msra.mxu0 %v5793_v14  ;;  %v5877_v14 = vld [vmem:[#allocation8 + $0x1a0] ss:$8 sps:$4 sm:$0xff]  }
 0x213   :  { %2794 = vmatprep.subr.bf16.mxu0 %v5801_v16  ;;  %v557_v16 = vsub.s32 6, %v6493_v26 }
 0x216   :  { %2795 = vmatpush1.bf16.msra.mxu0 %v5799_v17  ;;  %v5882_v17 = vld [vmem:[#allocation8 + $0x1b4] ss:$8 sps:$4 sm:$0xff]  }
 0x217   :  { %2796 = vmatprep.subr.bf16.mxu0 %v5807_v19  ;;  %v542_v19 = vrot.slane %v6499_v29, %v541_v12 }
 0x21a   :  { %2797 = vmatpush1.bf16.msra.mxu0 %v5805_v20  ;;  %v5880_v20 = vld [vmem:[#allocation8 + $0x1b0] ss:$8 sps:$4 sm:$0xff]  }
 0x21b   :  { %2798 = vmatprep.subr.bf16.mxu0 %v5813_v21  ;;  %v558_v21 = vrot.slane %v6499_v29, %v557_v16 }
 0x21e   :  { %2799 = vmatpush1.bf16.msra.mxu0 %v5811_v22  ;;  %v5885_v22 = vld [vmem:[#allocation8 + $0x1c4] ss:$8 sps:$4 sm:$0xff]  }
 0x21f   :  { %2809 = vmatprep.subr.bf16.mxu0 %v5819_v13 }
 0x221   :  { %2801 = vmatmul.mubr.bf16.vlgmr.msra.gmra.mrb[4].mxu0 %v6463_v18  ;;  %v534_v18 = vrot.slane %v6499_v29, %v6497_v28 }
 0x222   :  { %2810 = vmatpush1.bf16.msra.mxu0 %v5817_v25  ;;  %2841 = vmatprep.mubr.bf16.mxu0 %v6281_v23  ;;  %v5883_v25 = vld [vmem:[#allocation8 + $0x1c0] ss:$8 sps:$4 sm:$0xff]  }
 0x22d   :  { %4922 = vmatmul.mubr.msk.bf16.vlgmr.msra.gmra.mrb[4].mxu0 %vm2354_vm0, %v6056_v27 }
 0x234   :  { %v2515_v35 = vpop.f32.mrb[0].mxu0  ;;  %v6512_v36 = vpop.f32.mrb[0].mxu1 }
 0x235   :  { %v5228_v37 = vadd.f32 %v2515_v35, %v534_v18  ;;  %v2517_v38 = vpop.f32.mrb[1].mxu0  ;;  %v2681_v39 = vpop.f32.mrb[1].mxu1  ;;  %v5230_v13 = vadd.f32 %v6512_v36, %v542_v19  ;;  %v5888_v18 = vld [vmem:[#allocation8 + $0x1d4] ss:$8 sps:$4 sm:$0xff]  }
 0x236   :  { %v5229_v40 = vadd.f32 %v2517_v38, %v538_v33  ;;  %v5231_v41 = vadd.f32 %v2681_v39, %v546_v34  ;;  %v2519_v48 = vpop.f32.mrb[2].mxu0  ;;  %v2683_v42 = vpop.f32.mrb[2].mxu1  ;;  %v5886_v38 = vld [vmem:[#allocation8 + $0x1d0] ss:$8 sps:$4 sm:$0xff]   ;;  %v5894_v36 = vld [vmem:[#allocation8 + $0x1f4] ss:$8 sps:$4 sm:$0xff]  }
 0x237   :  { %v2520_v5 = vpop.f32.mrb[3].mxu0  ;;  %v2684_v43 = vpop.f32.mrb[3].mxu1  ;;  %6042 = vtanh.f32 %v5228_v37  ;;  %v5892_v48 = vld [vmem:[#allocation8 + $0x1f0] ss:$8 sps:$4 sm:$0xff]   ;;  %v5897_v42 = vld [vmem:[#allocation8 + $0x204] ss:$8 sps:$4 sm:$0xff]  }
 0x238   :  { %6044 = vtanh.f32 %v5229_v40  ;;  %v5891_v40 = vld [vmem:[#allocation8 + $0x1e4] ss:$8 sps:$4 sm:$0xff]   ;;  %v5895_v43 = vld [vmem:[#allocation8 + $0x200] ss:$8 sps:$4 sm:$0xff]   ;;  %v5924_v19 = vld [vmem:[#allocation8 + $0x294] ss:$8 sps:$4 sm:$0xff]  }
 0x239   :  { %6046 = vtanh.f32 %v5231_v41  ;;  %v5889_v41 = vld [vmem:[#allocation8 + $0x1e0] ss:$8 sps:$4 sm:$0xff]  }
 0x23a   :  { %6048 = vtanh.f32 %v5230_v13  ;;  %v5927_v13 = vld [vmem:[#allocation8 + $0x2a4] ss:$8 sps:$4 sm:$0xff]  }
 0x241   :  { %v6043_v10 = vpop.eup %6042 }
 0x242   :  { %v6045_v44 = vpop.eup %6044  ;;  %v3017_v47 = vpack.c.bf16 %v6043_v10, %v6043_v10 }
 0x243   :  { %v6047_v45 = vpop.eup %6046  ;;  %v3018_v46 = vpack.c.bf16 %v6045_v44, %v6045_v44  ;;  %v5900_v44 = vld [vmem:[#allocation8 + $0x214] ss:$8 sps:$4 sm:$0xff]  }
 0x244   :  { %v3020_v30 = vpack.c.bf16 %v6047_v45, %v6047_v45  ;;  %v6049_v5 = vpop.eup %6048  ;;  %v5898_v45 = vld [vmem:[#allocation8 + $0x210] ss:$8 sps:$4 sm:$0xff]  }
 0x245   :  { %3659 = vmatprep.mubr.bf16.mxu1 %v3018_v46  ;;  %v3019_v10 = vpack.c.bf16 %v6049_v5, %v6049_v5  ;;  %v5903_v46 = vld [vmem:[#allocation8 + $0x224] ss:$8 sps:$4 sm:$0xff]   ;;  %v5940_v5 = vld [vmem:[#allocation8 + $0x2f0] ss:$8 sps:$4 sm:$0xff]  }
 0x246   :  { %3660 = vmatmul.mubr.bf16.vlgmr.msra.gmra.mrb[20].mxu1 %v3017_v47  ;;  %v5906_v47 = vld [vmem:[#allocation8 + $0x234] ss:$8 sps:$4 sm:$0xff]  }
 0x247   :  { %3669 = vmatpush1.bf16.msra.mxu1 %v5847_v15  ;;  %3700 = vmatprep.mubr.bf16.mxu1 %v3020_v30  ;;  %v5901_v15 = vld [vmem:[#allocation8 + $0x220] ss:$8 sps:$4 sm:$0xff]   ;;  %v5909_v30 = vld [vmem:[#allocation8 + $0x244] ss:$8 sps:$4 sm:$0xff]  }
 0x248   :  { %3670 = vmatprep.subr.bf16.mxu1 %v5852_v49  ;;  %v5904_v49 = vld [vmem:[#allocation8 + $0x230] ss:$8 sps:$4 sm:$0xff]  }
 0x24b   :  { %3671 = vmatpush1.bf16.msra.mxu1 %v5850_v50 }
 0x24c   :  { %3672 = vmatprep.subr.bf16.mxu1 %v5855_v51  ;;  %v5907_v51 = vld [vmem:[#allocation8 + $0x240] ss:$8 sps:$4 sm:$0xff]  }
 0x24f   :  { %3673 = vmatpush1.bf16.msra.mxu1 %v5853_v52 }
 0x250   :  { %3674 = vmatprep.subr.bf16.mxu1 %v5858_v53  ;;  %v5912_v53 = vld [vmem:[#allocation8 + $0x254] ss:$8 sps:$4 sm:$0xff]  }
 0x253   :  { %3675 = vmatpush1.bf16.msra.mxu1 %v5856_v54 }
 0x254   :  { %v5119_v57 = vpop.f32.mrb[4].mxu1  ;;  %3676 = vmatprep.subr.bf16.mxu1 %v5861_v55 }
 0x255   :  { %v5120_v59 = vpop.f32.mrb[5].mxu1 }
 0x256   :  { %v5121_v60 = vadd.f32 %v5120_v59, %v5119_v57  ;;  %v5122_v61 = vpop.f32.mrb[6].mxu1  ;;  %v5915_v59 = vld [vmem:[#allocation8 + $0x264] ss:$8 sps:$4 sm:$0xff]  }
 0x257   :  { %v5123_v62 = vpop.f32.mrb[7].mxu1  ;;  %3677 = vmatpush1.bf16.msra.mxu1 %v5859_v56  ;;  %v5913_v61 = vld [vmem:[#allocation8 + $0x260] ss:$8 sps:$4 sm:$0xff]  }
 0x258   :  { %3678 = vmatprep.subr.bf16.mxu1 %v5864_v58  ;;  %v2885_v24 = vadd.f32 %v5121_v60, %v558_v21  ;;  %v5910_v58 = vld [vmem:[#allocation8 + $0x250] ss:$8 sps:$4 sm:$0xff]  }
 0x259   :  { %v5952_v21 = vld [vmem:[#allocation11 + $0x58] sm:$0xff]  }
 0x25b   :  { %3679 = vmatpush1.bf16.msra.mxu1 %v5862_v63  ;;  %v5918_v63 = vld [vmem:[#allocation8 + $0x274] ss:$8 sps:$4 sm:$0xff]  }
 0x25c   :  { %3680 = vmatprep.subr.bf16.mxu1 %v5867_v0 }
 0x25f   :  { %3681 = vmatpush1.bf16.msra.mxu1 %v5865_v2 }
 0x260   :  { %3682 = vmatprep.subr.bf16.mxu1 %v5870_v3  ;;  %v5946_v3 = vld [vmem:[#allocation11 + $0x40] sm:$0xff]  }
 0x261   :  { %5171 = vmatprep.subr.bf16.mxu0 %v5946_v3  ;;  %v5977_v3 = vld [vmem:[%s6764_s7 + $0xc0] ss:$28 sps:$4 sm:$0xff]  }
 0x263   :  { %3683 = vmatpush1.bf16.msra.mxu1 %v5868_v4  ;;  %v5947_v4 = vld [vmem:[#allocation11] sm:$0xff]  }
 0x264   :  { %3684 = vmatprep.subr.bf16.mxu1 %v5873_v6  ;;  %v5948_v6 = vld [vmem:[#allocation11 + $0x48] sm:$0xff]   ;;  %5172 = vmatpush3.bf16.msra.mxu0 %v5947_v4 }
 0x265   :  { %5173 = vmatprep.subr.bf16.mxu0 %v5948_v6  ;;  %v5981_v4 = vld [vmem:[%s6764_s7 + $0xf8] ss:$28 sps:$4 sm:$0xff]   ;;  %v5985_v6 = vld [vmem:[%s6764_s7 + $0x130] ss:$28 sps:$4 sm:$0xff]  }
 0x267   :  { %3685 = vmatpush1.bf16.msra.mxu1 %v5871_v7 }
 0x268   :  { %3686 = vmatprep.subr.bf16.mxu1 %v5876_v8  ;;  %v5916_v8 = vld [vmem:[#allocation8 + $0x270] ss:$8 sps:$4 sm:$0xff]  }
 0x26b   :  { %3687 = vmatpush1.bf16.msra.mxu1 %v5874_v9  ;;  %v5921_v9 = vld [vmem:[#allocation8 + $0x284] ss:$8 sps:$4 sm:$0xff]  }
 0x26c   :  { %3688 = vmatprep.subr.bf16.mxu1 %v5879_v11  ;;  %v5949_v11 = vld [vmem:[#allocation11 + $0x8] sm:$0xff]  }
 0x26d   :  { %5174 = vmatpush3.bf16.msra.mxu0 %v5949_v11 }
 0x26f   :  { %3689 = vmatpush1.bf16.msra.mxu1 %v5877_v14  ;;  %v5950_v14 = vld [vmem:[#allocation11 + $0x50] sm:$0xff]  }
 0x270   :  { %3690 = vmatprep.subr.bf16.mxu1 %v5882_v17  ;;  %v5919_v17 = vld [vmem:[#allocation8 + $0x280] ss:$8 sps:$4 sm:$0xff]   ;;  %5175 = vmatprep.subr.bf16.mxu0 %v5950_v14 }
 0x273   :  { %3691 = vmatpush1.bf16.msra.mxu1 %v5880_v20  ;;  %v5951_v20 = vld [vmem:[#allocation11 + $0x10] sm:$0xff]  }
 0x274   :  { %v5141_v27 = vpop.f32.mrb[8].mxu1  ;;  %3692 = vmatprep.subr.bf16.mxu1 %v5885_v22  ;;  %v5922_v22 = vld [vmem:[#allocation8 + $0x290] ss:$8 sps:$4 sm:$0xff]   ;;  %5176 = vmatpush3.bf16.msra.mxu0 %v5951_v20 }
 0x275   :  { %v5142_v33 = vpop.f32.mrb[9].mxu1  ;;  %5177 = vmatprep.subr.bf16.mxu0 %v5952_v21 }
 0x276   :  { %v5143_v34 = vadd.f32 %v5142_v33, %v5141_v27  ;;  %v5144_v35 = vpop.f32.mrb[10].mxu1  ;;  %v5925_v27 = vld [vmem:[#allocation8 + $0x2a0] ss:$8 sps:$4 sm:$0xff]   ;;  %v5955_v33 = vld [vmem:[#allocation11 + $0x20] sm:$0xff]  }
 0x277   :  { %v5145_v37 = vpop.f32.mrb[11].mxu1  ;;  %3693 = vmatpush1.bf16.msra.mxu1 %v5883_v25  ;;  %v5953_v25 = vld [vmem:[#allocation11 + $0x18] sm:$0xff]  }
 0x278   :  { %v2925_v39 = vadd.f32 %v5143_v34, %v2885_v24  ;;  %3694 = vmatprep.subr.bf16.mxu1 %v5888_v18  ;;  %v5954_v24 = vld [vmem:[#allocation11 + $0x60] sm:$0xff]   ;;  %5178 = vmatpush3.bf16.msra.mxu0 %v5953_v25  ;;  %v5956_v34 = vld [vmem:[#allocation11 + $0x68] sm:$0xff]   ;;  %v5933_v37 = vld [vmem:[#allocation8 + $0x2c4] ss:$8 sps:$4 sm:$0xff]  }
 0x279   :  { %v5930_v18 = vld [vmem:[#allocation8 + $0x2b4] ss:$8 sps:$4 sm:$0xff]   ;;  %5179 = vmatprep.subr.bf16.mxu0 %v5954_v24  ;;  %v5928_v35 = vld [vmem:[#allocation8 + $0x2b0] ss:$8 sps:$4 sm:$0xff]   ;;  %v5962_v24 = vld [vmem:[%s6764_s7] ss:$28 sps:$4 sm:$0xff]  }
 0x27b   :  { %3695 = vmatpush1.bf16.msra.mxu1 %v5886_v38  ;;  %v5957_v38 = vld [vmem:[#allocation11 + $0x28] sm:$0xff]  }
 0x27c   :  { %3696 = vmatprep.subr.bf16.mxu1 %v5891_v40  ;;  %5180 = vmatpush3.bf16.msra.mxu0 %v5955_v33  ;;  %v5936_v40 = vld [vmem:[#allocation8 + $0x2d4] ss:$8 sps:$4 sm:$0xff]  }
 0x27d   :  { %5181 = vmatprep.subr.bf16.mxu0 %v5956_v34  ;;  %v5966_v33 = vld [vmem:[%s6764_s7 + $0x38] ss:$28 sps:$4 sm:$0xff]  }
 0x27e   :  { %v5972_v34 = vld [vmem:[%s6764_s7 + $0x74] ss:$28 sps:$4 sm:$0xff]  }
 0x27f   :  { %3697 = vmatpush1.bf16.msra.mxu1 %v5889_v41  ;;  %v5934_v41 = vld [vmem:[#allocation8 + $0x2d0] ss:$8 sps:$4 sm:$0xff]  }
 0x280   :  { %3698 = vmatprep.subr.bf16.mxu1 %v5894_v36  ;;  %5182 = vmatpush3.bf16.msra.mxu0 %v5957_v38  ;;  %v5939_v36 = vld [vmem:[#allocation8 + $0x2e4] ss:$8 sps:$4 sm:$0xff]  }
 0x281   :  { %v5974_v38 = vld [vmem:[%s6764_s7 + $0xa8] ss:$28 sps:$4 sm:$0xff]  }
 0x283   :  { %3699 = vmatpush1.bf16.msra.mxu1 %v5892_v48  ;;  %v5937_v48 = vld [vmem:[#allocation8 + $0x2e0] ss:$8 sps:$4 sm:$0xff]  }
 0x284   :  { %3709 = vmatprep.subr.bf16.mxu1 %v5897_v42  ;;  %v5942_v42 = vld [vmem:[#allocation8 + $0x2f4] ss:$8 sps:$4 sm:$0xff]  }
 0x286   :  { %3701 = vmatmul.mubr.bf16.vlgmr.msra.gmra.mrb[20].mxu1 %v3019_v10  ;;  %v549_v10 = vsub.s32 4, %v6493_v26 }
 0x287   :  { %3710 = vmatpush1.bf16.msra.mxu1 %v5895_v43  ;;  %v5945_v43 = vld [vmem:[#allocation8 + $0x304] ss:$8 sps:$4 sm:$0xff]  }
 0x288   :  { %3711 = vmatprep.subr.bf16.mxu1 %v5900_v44  ;;  %v553_v44 = vsub.s32 5, %v6493_v26 }
 0x28b   :  { %3712 = vmatpush1.bf16.msra.mxu1 %v5898_v45  ;;  %v550_v45 = vrot.slane %v6499_v29, %v549_v10 }
 0x28c   :  { %3713 = vmatprep.subr.bf16.mxu1 %v5903_v46  ;;  %v554_v46 = vrot.slane %v6499_v29, %v553_v44 }
 0x28f   :  { %3714 = vmatpush1.bf16.msra.mxu1 %v5901_v15 }
 0x290   :  { %3715 = vmatprep.subr.bf16.mxu1 %v5906_v47 }
 0x293   :  { %3716 = vmatpush1.bf16.msra.mxu1 %v5904_v49 }
 0x294   :  { %v5163_v50 = vpop.f32.mrb[12].mxu1  ;;  %3717 = vmatprep.subr.bf16.mxu1 %v5909_v30 }
 0x295   :  { %v5164_v52 = vpop.f32.mrb[13].mxu1 }
 0x296   :  { %v5165_v54 = vadd.f32 %v5164_v52, %v5163_v50  ;;  %v5166_v55 = vpop.f32.mrb[14].mxu1 }
 0x297   :  { %v5167_v56 = vpop.f32.mrb[15].mxu1  ;;  %3718 = vmatpush1.bf16.msra.mxu1 %v5907_v51  ;;  %v5943_v55 = vld [vmem:[#allocation8 + $0x300] ss:$8 sps:$4 sm:$0xff]  }
 0x298   :  { %v2965_v57 = vadd.f32 %v5165_v54, %v2925_v39  ;;  %3719 = vmatprep.subr.bf16.mxu1 %v5912_v53  ;;  %v5931_v39 = vld [vmem:[#allocation8 + $0x2c0] ss:$8 sps:$4 sm:$0xff]  }
 0x29b   :  { %3720 = vmatpush1.bf16.msra.mxu1 %v5910_v58  ;;  %v5958_v58 = vld [vmem:[#allocation11 + $0x70] sm:$0xff]  }
 0x29c   :  { %v3004_v60 = vpop.f32.mrb[16].mxu1  ;;  %3721 = vmatprep.subr.bf16.mxu1 %v5915_v59  ;;  %v5959_v59 = vld [vmem:[#allocation11 + $0x30] sm:$0xff]   ;;  %5183 = vmatprep.subr.bf16.mxu0 %v5958_v58  ;;  %v6000_v58 = vld [vmem:[%s6764_s7 + $0x78] ss:$28 sps:$4 sm:$0xff]  }
 0x29d   :  { %v6523_v62 = vadd.f32 %v3004_v60, %v2965_v57  ;;  %v5206_v0 = vpop.f32.mrb[17].mxu1  ;;  %5184 = vmatpush3.bf16.msra.mxu0 %v5959_v59  ;;  %v5960_v60 = vld [vmem:[#allocation11 + $0x78] sm:$0xff]   ;;  %v6005_v59 = vld [vmem:[%s6764_s7 + $0xb4] ss:$28 sps:$4 sm:$0xff]  }
 0x29e   :  { %v3007_v2 = vpop.f32.mrb[18].mxu1  ;;  %5185 = vmatprep.subr.bf16.mxu0 %v5960_v60  ;;  %v5969_v0 = vld [vmem:[%s6764_s7 + $0x50] ss:$28 sps:$4 sm:$0xff]  }
 0x29f   :  { %v5207_v7 = vpop.f32.mrb[19].mxu1  ;;  %3722 = vmatpush1.bf16.msra.mxu1 %v5913_v61  ;;  %v5961_v61 = vld [vmem:[#allocation11 + $0x38] sm:$0xff]  }
 0x2a0   :  { %3723 = vmatprep.subr.bf16.mxu1 %v5918_v63  ;;  %v5965_v63 = vld [vmem:[%s6764_s7 + $0x18] ss:$28 sps:$4 sm:$0xff]   ;;  %v5973_v2 = vld [vmem:[%s6764_s7 + $0x88] ss:$28 sps:$4 sm:$0xff]   ;;  %v3122_v7 = vld [vmem:[#allocation10] sm:$0x3] }
 0x2a1   :  { %5186 = vmatpush3.bf16.msra.mxu0 %v5961_v61  ;;  %v6003_v60 = vld [vmem:[%s6764_s7 + $0xb0] ss:$28 sps:$4 sm:$0xff]  }
 0x2a2   :  { %v6008_v61 = vld [vmem:[%s6764_s7 + $0xec] ss:$28 sps:$4 sm:$0xff]  }
 0x2a3   :  { %3724 = vmatpush1.bf16.msra.mxu1 %v5916_v8  ;;  %v3127_v8 = vrot.slane %v3122_v7, %v6497_v28 }
 0x2a4   :  { %3725 = vmatprep.subr.bf16.mxu1 %v5921_v9  ;;  %v3131_v9 = vrot.slane %v3122_v7, %v6502_v31  ;;  %v6020_v7 = vld [vmem:[%s6764_s7 + $0x14] ss:$28 sps:$4 sm:$0xff]  }
 0x2a7   :  { %3726 = vmatpush1.bf16.msra.mxu1 %v5919_v17 }
 0x2a8   :  { %3727 = vmatprep.subr.bf16.mxu1 %v5924_v19 }
 0x2ab   :  { %3728 = vmatpush1.bf16.msra.mxu1 %v5922_v22 }
 0x2ac   :  { %3729 = vmatprep.subr.bf16.mxu1 %v5927_v13 }
 0x2af   :  { %3730 = vmatpush1.bf16.msra.mxu1 %v5925_v27 }
 0x2b0   :  { %3731 = vmatprep.subr.bf16.mxu1 %v5930_v18  ;;  %v5968_v18 = vld [vmem:[%s6764_s7 + $0x3c] ss:$28 sps:$4 sm:$0xff]  }
 0x2b3   :  { %3732 = vmatpush1.bf16.msra.mxu1 %v5928_v35  ;;  %v5970_v35 = vld [vmem:[%s6764_s7 + $0x70] ss:$28 sps:$4 sm:$0xff]  }
 0x2b4   :  { %3733 = vmatprep.subr.bf16.mxu1 %v5933_v37  ;;  %v5976_v37 = vld [vmem:[%s6764_s7 + $0xac] ss:$28 sps:$4 sm:$0xff]  }
 0x2b7   :  { %3734 = vmatpush1.bf16.msra.mxu1 %v5931_v39  ;;  %v5980_v39 = vld [vmem:[%s6764_s7 + $0xe4] ss:$28 sps:$4 sm:$0xff]  }
 0x2b8   :  { %3735 = vmatprep.subr.bf16.mxu1 %v5936_v40  ;;  %v5978_v40 = vld [vmem:[%s6764_s7 + $0xe0] ss:$28 sps:$4 sm:$0xff]  }
 0x2bb   :  { %3736 = vmatpush1.bf16.msra.mxu1 %v5934_v41  ;;  %v5984_v41 = vld [vmem:[%s6764_s7 + $0x11c] ss:$28 sps:$4 sm:$0xff]  }
 0x2bc   :  { %3737 = vmatprep.subr.bf16.mxu1 %v5939_v36  ;;  %v5982_v36 = vld [vmem:[%s6764_s7 + $0x118] ss:$28 sps:$4 sm:$0xff]  }
 0x2bf   :  { %3738 = vmatpush1.bf16.msra.mxu1 %v5937_v48  ;;  %v5988_v48 = vld [vmem:[%s6764_s7 + $0x154] ss:$28 sps:$4 sm:$0xff]  }
 0x2c0   :  { %3739 = vmatprep.subr.bf16.mxu1 %v5942_v42  ;;  %v5986_v42 = vld [vmem:[%s6764_s7 + $0x150] ss:$28 sps:$4 sm:$0xff]  }
 0x2c3   :  { %3740 = vmatpush1.bf16.msra.mxu1 %v5940_v5  ;;  %v5989_v5 = vld [vmem:[%s6764_s7 + $0x168] ss:$28 sps:$4 sm:$0xff]  }
 0x2c4   :  { %3750 = vmatprep.subr.bf16.mxu1 %v5945_v43  ;;  %v5992_v43 = vld [vmem:[%s6764_s7 + $0x18c] ss:$28 sps:$4 sm:$0xff]  }
 0x300   :  { %v2843_v15 = vpop.f32.mrb[4].mxu0 }
 0x301   :  { %v5232_v47 = vadd.f32 %v2843_v15, %v550_v45  ;;  %v2845_v49 = vpop.f32.mrb[5].mxu0  ;;  %v5990_v45 = vld [vmem:[%s6764_s7 + $0x188] ss:$28 sps:$4 sm:$0xff]  }
 0x302   :  { %v5233_v30 = vadd.f32 %v2845_v49, %v554_v46  ;;  %v2847_v50 = vpop.f32.mrb[6].mxu0  ;;  %v5993_v46 = vld [vmem:[%s6764_s7 + $0x1a0] ss:$28 sps:$4 sm:$0xff]   ;;  %v5996_v15 = vld [vmem:[%s6764_s7 + $0xc] ss:$28 sps:$4 sm:$0xff]  }
 0x303   :  { %6050 = vtanh.f32 %v5232_v47  ;;  %v2848_v51 = vpop.f32.mrb[7].mxu0  ;;  %v5023_v49 = vld [vmem:[#allocation13] ss:$0 sm:$0xff] }
 0x304   :  { %6052 = vtanh.f32 %v5233_v30 }
 0x305   :  { %6054 = vtanh.f32 %v6523_v62  ;;  %v5964_v62 = vld [vmem:[%s6764_s7 + $0x4] ss:$28 sps:$4 sm:$0xff]  }
 0x306   :  { %4360 = vmatprep.subr.bf16.mxu0 %v5964_v62  ;;  %v6006_v62 = vld [vmem:[%s6764_s7 + $0xe8] ss:$28 sps:$4 sm:$0xff]  }
 0x30d   :  { %v6051_v52 = vpop.eup %6050 }
 0x30e   :  { %v6053_v53 = vpop.eup %6052  ;;  %v3021_v56 = vpack.c.bf16 %v6051_v52, %v6051_v52 }
 0x30f   :  { %v3022_v54 = vpack.c.bf16 %v6053_v53, %v6053_v53  ;;  %v6055_v29 = vpop.eup %6054 }
 0x310   :  { %v3023_v57 = vpack.c.bf16 %v6055_v29, %v6055_v29  ;;  %v5997_v29 = vld [vmem:[%s6764_s7 + $0x40] ss:$28 sps:$4 sm:$0xff]  }
 0x311   :  { %3741 = vmatprep.mubr.bf16.mxu1 %v3022_v54  ;;  %v5994_v54 = vld [vmem:[%s6764_s7 + $0x8] ss:$28 sps:$4 sm:$0xff]  }
 0x312   :  { %3742 = vmatmul.mubr.bf16.vlgmr.msra.gmra.mrb[20].mxu1 %v3021_v56  ;;  %v5999_v56 = vld [vmem:[%s6764_s7 + $0x44] ss:$28 sps:$4 sm:$0xff]  }
 0x313   :  { %3751 = vmatpush1.bf16.msra.mxu1 %v5943_v55  ;;  %3782 = vmatprep.mubr.bf16.mxu1 %v6281_v23 }
 0x314   :  { %5208 = vmatprep.subr.bf16.mxu1 %v6282_v1 }
 0x31e   :  { %5022 = vmatmul.mubr.msk.bf16.vlgmr.msra.gmra.mrb[20].mxu1 %vm2354_vm0, %v3023_v57  ;;  %v6002_v57 = vld [vmem:[%s6764_s7 + $0x7c] ss:$28 sps:$4 sm:$0xff]  }
 0x31f   :  { %5224 = vmatprep.mubr.msk.bf16.mxu1 %vm6283_vm1, %v6282_v1  ;;  %5209 = vmatpush3.bf16.msra.mxu1 %v5965_v63  ;;  %v6011_v63 = vld [vmem:[%s6764_s7 + $0x124] ss:$28 sps:$4 sm:$0xff]  }
 0x320   :  { %5210 = vmatprep.subr.bf16.mxu1 %v6282_v1 }
 0x323   :  { %5211 = vmatpush3.bf16.msra.mxu1 %v5969_v0  ;;  %v6009_v0 = vld [vmem:[%s6764_s7 + $0x120] ss:$28 sps:$4 sm:$0xff]  }
 0x324   :  { %5212 = vmatprep.subr.bf16.mxu1 %v6282_v1 }
 0x327   :  { %5213 = vmatpush3.bf16.msra.mxu1 %v5973_v2  ;;  %v6014_v2 = vld [vmem:[%s6764_s7 + $0x15c] ss:$28 sps:$4 sm:$0xff]  }
 0x328   :  { %5214 = vmatprep.subr.bf16.mxu1 %v6282_v1 }
 0x32b   :  { %5215 = vmatpush3.bf16.msra.mxu1 %v5977_v3  ;;  %v6012_v3 = vld [vmem:[%s6764_s7 + $0x158] ss:$28 sps:$4 sm:$0xff]  }
 0x32c   :  { %5216 = vmatprep.subr.bf16.mxu1 %v6282_v1 }
 0x32f   :  { %5217 = vmatpush3.bf16.msra.mxu1 %v5981_v4  ;;  %v6017_v4 = vld [vmem:[%s6764_s7 + $0x194] ss:$28 sps:$4 sm:$0xff]  }
 0x330   :  { %5218 = vmatprep.subr.bf16.mxu1 %v6282_v1 }
 0x333   :  { %5219 = vmatpush3.bf16.msra.mxu1 %v5985_v6  ;;  %v6015_v6 = vld [vmem:[%s6764_s7 + $0x190] ss:$28 sps:$4 sm:$0xff]  }
 0x334   :  { %5220 = vmatprep.subr.bf16.mxu1 %v6282_v1 }
 0x337   :  { %5221 = vmatpush3.bf16.msra.mxu1 %v5989_v5 }
 0x338   :  { %5222 = vmatprep.subr.bf16.mxu1 %v6282_v1 }
 0x33b   :  { %5223 = vmatpush3.bf16.msra.mxu1 %v5993_v46 }
 0x3f1   :  { %v3784_v11 = vpop.f32.mrb[20].mxu1 }
 0x3f2   :  { %v5234_v14 = vadd.f32 %v3784_v11, %v3127_v8  ;;  %v3786_v17 = vpop.f32.mrb[21].mxu1  ;;  %v6018_v8 = vld [vmem:[%s6764_s7 + $0x10] ss:$28 sps:$4 sm:$0xff]   ;;  %v6021_v11 = vld [vmem:[%s6764_s7 + $0x48] ss:$28 sps:$4 sm:$0xff]  }
 0x3f3   :  { %v5235_v19 = vadd.f32 %v3786_v17, %v3131_v9  ;;  %v3788_v20 = vpop.f32.mrb[22].mxu1  ;;  %v6023_v9 = vld [vmem:[%s6764_s7 + $0x4c] ss:$28 sps:$4 sm:$0xff]   ;;  %v6024_v17 = vld [vmem:[%s6764_s7 + $0x80] ss:$28 sps:$4 sm:$0xff]  }
 0x3f4   :  { %v3791_v21 = vmax.f32 %v5234_v14, 0.0  ;;  %v3789_v22 = vpop.f32.mrb[23].mxu1  ;;  %v6026_v14 = vld [vmem:[%s6764_s7 + $0x84] ss:$28 sps:$4 sm:$0xff]   ;;  %v6032_v20 = vld [vmem:[%s6764_s7 + $0xf4] ss:$28 sps:$4 sm:$0xff]  }
 0x3f5   :  { %v3792_v13 = vmax.f32 %v5235_v19, 0.0  ;;  %v6029_v19 = vld [vmem:[%s6764_s7 + $0xbc] ss:$28 sps:$4 sm:$0xff]   ;;  %v6035_v22 = vld [vmem:[%s6764_s7 + $0x12c] ss:$28 sps:$4 sm:$0xff]  }
 0x3f6   :  { %v3793_v27 = vpack.c.bf16 %v3791_v21, %v3791_v21  ;;  %v6030_v21 = vld [vmem:[%s6764_s7 + $0xf0] ss:$28 sps:$4 sm:$0xff]  }
 0x3f7   :  { %v3794_v25 = vpack.c.bf16 %v3792_v13, %v3792_v13  ;;  %v6033_v13 = vld [vmem:[%s6764_s7 + $0x128] ss:$28 sps:$4 sm:$0xff]  }
 0x3f9   :  { %3962 = vmatprep.mubr.bf16.mxu0 %v3794_v25  ;;  %v6038_v25 = vld [vmem:[%s6764_s7 + $0x164] ss:$28 sps:$4 sm:$0xff]  }
 0x3fa   :  { %3963 = vmatmul.mubr.bf16.vlgmr.msra.gmra.mrb[8].mxu0 %v3793_v27  ;;  %v6041_v27 = vld [vmem:[%s6764_s7 + $0x19c] ss:$28 sps:$4 sm:$0xff]  }
 0x3fb   :  { %4361 = vmatpush1.bf16.msra.mxu0 %v5962_v24  ;;  %4392 = vmatprep.mubr.bf16.mxu0 %v6281_v23  ;;  %v6036_v24 = vld [vmem:[%s6764_s7 + $0x160] ss:$28 sps:$4 sm:$0xff]  }
 0x3fc   :  { %4362 = vmatprep.subr.bf16.mxu0 %v5968_v18  ;;  %v6039_v18 = vld [vmem:[%s6764_s7 + $0x198] ss:$28 sps:$4 sm:$0xff]  }
 0x3ff   :  { %4363 = vmatpush1.bf16.msra.mxu0 %v5966_v33  ;;  %v4035_v33 = vld [vmem:[#allocation14] sm:$0x7f] }
 0x400   :  { %4364 = vmatprep.subr.bf16.mxu0 %v5972_v34  ;;  %v4040_v34 = vrot.slane %v4035_v33, %v6497_v28 }
 0x403   :  { %4365 = vmatpush1.bf16.msra.mxu0 %v5970_v35  ;;  %v4064_v35 = vrot.slane %v4035_v33, %v557_v16  ;;  %v4048_v16 = vrot.slane %v4035_v33, %v541_v12  ;;  %v4056_v12 = vrot.slane %v4035_v33, %v549_v10 }
 0x404   :  { %4366 = vmatprep.subr.bf16.mxu0 %v5976_v37  ;;  %v4044_v37 = vrot.slane %v4035_v33, %v6502_v31 }
 0x407   :  { %4367 = vmatpush1.bf16.msra.mxu0 %v5974_v38 }
 0x408   :  { %4368 = vmatprep.subr.bf16.mxu0 %v5980_v39 }
 0x40b   :  { %4369 = vmatpush1.bf16.msra.mxu0 %v5978_v40 }
 0x40c   :  { %4370 = vmatprep.subr.bf16.mxu0 %v5984_v41 }
 0x40f   :  { %4371 = vmatpush1.bf16.msra.mxu0 %v5982_v36 }
 0x410   :  { %4372 = vmatprep.subr.bf16.mxu0 %v5988_v48 }
 0x413   :  { %4373 = vmatpush1.bf16.msra.mxu0 %v5986_v42 }
 0x414   :  { %4374 = vmatprep.subr.bf16.mxu0 %v5992_v43 }
 0x417   :  { %4375 = vmatpush1.bf16.msra.mxu0 %v5990_v45 }
 0x418   :  { %4401 = vmatprep.subr.bf16.mxu0 %v5996_v15 }
 0x4cd   :  { %v5187_v47 = vpop.f32.mrb[8].mxu0 }
 0x4ce   :  { %v5188_v30 = vpop.f32.mrb[9].mxu0 }
 0x4cf   :  { %v5189_v50 = vadd.f32 %v5188_v30, %v5187_v47  ;;  %v5190_v51 = vpop.f32.mrb[10].mxu0  ;;  %v4052_v47 = vrot.slane %v4035_v33, %v545_v32  ;;  %v4060_v32 = vrot.slane %v4035_v33, %v553_v44 }
 0x4d0   :  { %v5191_v52 = vpop.f32.mrb[11].mxu0 }
 0x4d1   :  { %v3965_v53 = vadd.f32 %v5189_v50, %v5023_v49 }
 0x4d3   :  { %v6627_v55 = vpack.c.bf16 %v3965_v53, %v3965_v53 }
 0x4d5   :  { %4393 = vmatmul.mubr.bf16.vlgmr.msra.gmra.mrb[12].mxu0 %v6627_v55  ;;  %5225 = vmatmul.mubr.bf16.vlgmr.msra.gmra.mrb[24].mxu1 %v6627_v55 }
 0x4d6   :  { %4402 = vmatpush1.bf16.msra.mxu0 %v5994_v54  ;;  %4433 = vmatprep.mubr.bf16.mxu0 %v6281_v23 }
 0x4d7   :  { %4403 = vmatprep.subr.bf16.mxu0 %v5999_v56 }
 0x4da   :  { %4404 = vmatpush1.bf16.msra.mxu0 %v5997_v29 }
 0x4db   :  { %4405 = vmatprep.subr.bf16.mxu0 %v6002_v57 }
 0x4de   :  { %4406 = vmatpush1.bf16.msra.mxu0 %v6000_v58 }
 0x4df   :  { %4407 = vmatprep.subr.bf16.mxu0 %v6005_v59 }
 0x4e2   :  { %4408 = vmatpush1.bf16.msra.mxu0 %v6003_v60 }
 0x4e3   :  { %4409 = vmatprep.subr.bf16.mxu0 %v6008_v61 }
 0x4e6   :  { %4410 = vmatpush1.bf16.msra.mxu0 %v6006_v62 }
 0x4e7   :  { %4411 = vmatprep.subr.bf16.mxu0 %v6011_v63 }
 0x4ea   :  { %4412 = vmatpush1.bf16.msra.mxu0 %v6009_v0 }
 0x4eb   :  { %4413 = vmatprep.subr.bf16.mxu0 %v6014_v2 }
 0x4ee   :  { %4414 = vmatpush1.bf16.msra.mxu0 %v6012_v3 }
 0x4ef   :  { %4415 = vmatprep.subr.bf16.mxu0 %v6017_v4 }
 0x4f2   :  { %4416 = vmatpush1.bf16.msra.mxu0 %v6015_v6 }
 0x4f3   :  { %4442 = vmatprep.subr.bf16.mxu0 %v6020_v7 }
 0x4f5   :  { %4434 = vmatmul.mubr.bf16.vlgmr.msra.gmra.mrb[16].mxu0 %v6627_v55 }
 0x4f6   :  { %4443 = vmatpush1.bf16.msra.mxu0 %v6018_v8  ;;  %4474 = vmatprep.mubr.bf16.mxu0 %v6281_v23  ;;  %v6027_v23 = vld [vmem:[%s6764_s7 + $0xb8] ss:$28 sps:$4 sm:$0xff]   ;;  %s6284_s7 = smov [#allocation16]  }
 0x4f7   :  { %4444 = vmatprep.subr.bf16.mxu0 %v6023_v9  ;;  %s4557_s15 = sshll.u32 %s6284_s7, 4  ;;  %s4558_s15 = int_to_ptr.vmem [resolvable:$true] %s4557_s15 }
 0x4f8   :  { %s6233_s6 = scalar_lea.vmem %s4558_s15, 896  ;;  %p6238_p9 = scmp.lt.s32.totalorder %s4558_s15, %s4558_s15 }
 0x4f9   :  { %p6234_p8 = scmp.ne.s32.totalorder %s4558_s15, %s6233_s6  ;;  %p6239_p10 = scmp.lt.s32.totalorder %s6233_s6, %s6233_s6 }
 0x4fa   :  { %4445 = vmatpush1.bf16.msra.mxu0 %v6021_v11 }
 0x4fb   :  { %4446 = vmatprep.subr.bf16.mxu0 %v6026_v14  ;;  %p6240_p11 = por %p6239_p10, %p6238_p9 }
 0x4fd   :  { %p6241_p12 = pnand %p6240_p11, %p6234_p8 }
 0x4fe   :  { %4447 = vmatpush1.bf16.msra.mxu0 %v6024_v17 }
 0x4ff   :  { %4448 = vmatprep.subr.bf16.mxu0 %v6029_v19 }
 0x502   :  { %4449 = vmatpush1.bf16.msra.mxu0 %v6027_v23 }
 0x503   :  { %4450 = vmatprep.subr.bf16.mxu0 %v6032_v20 }
 0x506   :  { %4451 = vmatpush1.bf16.msra.mxu0 %v6030_v21 }
 0x507   :  { %4452 = vmatprep.subr.bf16.mxu0 %v6035_v22 }
 0x50a   :  { %4453 = vmatpush1.bf16.msra.mxu0 %v6033_v13 }
 0x50b   :  { %4454 = vmatprep.subr.bf16.mxu0 %v6038_v25 }
 0x50e   :  { %4455 = vmatpush1.bf16.msra.mxu0 %v6036_v24 }
 0x50f   :  { %4456 = vmatprep.subr.bf16.mxu0 %v6041_v27 }
 0x512   :  { %4457 = vmatpush1.bf16.msra.mxu0 %v6039_v18 }
 0x515   :  { %4475 = vmatmul.mubr.bf16.vlgmr.msra.gmra.mrb[20].mxu0 %v6627_v55 }
 0x5a8   :  { %v4394_v38 = vpop.f32.mrb[12].mxu0  ;;  %v4517_v39 = vpop.f32.mrb[24].mxu1 }
 0x5a9   :  { %v4395_v40 = vadd.f32 %v4394_v38, %v4040_v34  ;;  %v4518_v41 = vadd.f32 %v4517_v39, %v4064_v35  ;;  %v4396_v36 = vpop.f32.mrb[13].mxu0  ;;  %v5226_v48 = vpop.f32.mrb[25].mxu1 }
 0x5aa   :  { %v4397_v42 = vadd.f32 %v4396_v36, %v4044_v37  ;;  %v4398_v5 = vpop.f32.mrb[14].mxu0  ;;  %v4520_v43 = vpop.f32.mrb[26].mxu1 }
 0x5ab   :  { %vm4523_vm2 = vcmp.gt.f32.partialorder %v4395_v40, 0.5  ;;  %vm4529_vm3 = vcmp.gt.f32.partialorder %v4518_v41, 0.5  ;;  %v4399_v45 = vpop.f32.mrb[15].mxu0  ;;  %v5227_v46 = vpop.f32.mrb[27].mxu1 }
 0x5ac   :  { %v5096_v28 = vsel %vm4523_vm2, 1.0, %v6282_v1  ;;  %v5102_v15 = vsel %vm4529_vm3, 1.0, %v6282_v1  ;;  %vm4524_vm4 = vcmp.gt.f32.partialorder %v4397_v42, 0.5 }
 0x5ad   :  { %4544 = vst [vmem:[#allocation16] sm:$0xff] %v5096_v28  ;;  %4550 = vst.msk [vmem:[#allocation16 + $0x30] sm:$0xff] %vm2354_vm0, %v5102_v15  ;;  %v5097_v31 = vsel %vm4524_vm4, 1.0, %v6282_v1 }
 0x5ae   :  { %4545 = vst [vmem:[#allocation16 + $0x8] sm:$0xff] %v5097_v31 }
 0x5c8   :  { %v4435_v49 = vpop.f32.mrb[16].mxu0 }
 0x5c9   :  { %v4436_v30 = vadd.f32 %v4435_v49, %v4048_v16  ;;  %v4437_v50 = vpop.f32.mrb[17].mxu0 }
 0x5ca   :  { %v4438_v51 = vadd.f32 %v4437_v50, %v4052_v47  ;;  %v4439_v52 = vpop.f32.mrb[18].mxu0 }
 0x5cb   :  { %vm4525_vm5 = vcmp.gt.f32.partialorder %v4436_v30, 0.5  ;;  %v4440_v53 = vpop.f32.mrb[19].mxu0 }
 0x5cc   :  { %v5098_v54 = vsel %vm4525_vm5, 1.0, %v6282_v1  ;;  %vm4526_vm6 = vcmp.gt.f32.partialorder %v4438_v51, 0.5 }
 0x5cd   :  { %4546 = vst [vmem:[#allocation16 + $0x10] sm:$0xff] %v5098_v54  ;;  %v5099_v55 = vsel %vm4526_vm6, 1.0, %v6282_v1 }
 0x5ce   :  { %4547 = vst [vmem:[#allocation16 + $0x18] sm:$0xff] %v5099_v55 }
 0x5e8   :  { %v4476_v56 = vpop.f32.mrb[20].mxu0 }
 0x5e9   :  { %v4477_v29 = vadd.f32 %v4476_v56, %v4056_v12  ;;  %v4478_v57 = vpop.f32.mrb[21].mxu0 }
 0x5ea   :  { %v4479_v58 = vadd.f32 %v4478_v57, %v4060_v32  ;;  %v4480_v59 = vpop.f32.mrb[22].mxu0 }
 0x5eb   :  { %vm4527_vm7 = vcmp.gt.f32.partialorder %v4477_v29, 0.5  ;;  %v4481_v60 = vpop.f32.mrb[23].mxu0 }
 0x5ec   :  { %v5100_v61 = vsel %vm4527_vm7, 1.0, %v6282_v1  ;;  %vm4528_vm8 = vcmp.gt.f32.partialorder %v4479_v58, 0.5 }
 0x5ed   :  { %4548 = vst [vmem:[#allocation16 + $0x20] sm:$0xff] %v5100_v61  ;;  %v5101_v62 = vsel %vm4528_vm8, 1.0, %v6282_v1 }
 0x5ee   :  { %4549 = vst [vmem:[#allocation16 + $0x28] sm:$0xff] %v5101_v62 }
 0x5ef   :  { %6244 = shalt.err (!%p6241_p12)
}
 0x5f0   :  { %s6245_s8 = scalar_lea.hbm %s6766_s9, 896 }
 0x5f1   :  { %p6246_p13 = scmp.ne.s32.totalorder %s6766_s9, %s6245_s8  ;;  %p6249_p0 = scmp.lt.u32.totalorder %s6245_s8, %s6766_s9 }
 0x5f3   :  { %p6251_p1 = pnand %p6249_p0, %p6246_p13 }
 0x5f5   :  { %6254 = shalt.err (!%p6251_p1)
}
 0x5f6   :  { %4560 = dma.vmem_to_hbm [thread:$0]  %s4558_s15, 896, %s6766_s9, [#allocation4]  }
 0x5f7   :  { %6265 = dma.done.wait [#allocation4], 896  }
 0x5f8   :  { %6266 = vsyncadd [#allocation4], 4294966400 }
 0x5f9   :  { %4564 = vsyncpa [#allocation3], 1 }
 0x5fa   :  { %4565 = vsyncpa [#allocation6], 1 }
 0x5fb   :  { %4566 = vsyncpa [#allocation9], 1 }
 0x5fc   :  { %4567 = vsyncpa [#allocation12], 1 }
 0x5fd   :  { %4568 = vsyncpa [#allocation15], 1 }
 0x5fe   :  { %4569 = vsyncpa [#allocation4], 1 }

</bundles_post_ra>
